<compile_context>
chip_gen: v7x
topology: tpu7x:2x2x1
jax: 0.10.0
libtpu: 0.0.40
codegen_flags: <defaults>
</compile_context>

<pallas_src>
import jax
import jax.numpy as jnp
from jax.experimental import pallas as pl
from jax.experimental.pallas import tpu as pltpu

# ----------------------------- config ---------------------------------------
B, S, H = 2, 8, 64          # batch, seq len, hidden
NH, DH = 4, 16              # num heads, head dim (NH * DH == H)
FFN = 4 * H                 # feed-forward dim
L = 2                       # number of transformer blocks
VOCAB = 128
NUM_CLASSES = 4
LANE = 128                  # lane width for the padded, lane-dense classifier output
EPS = 1e-12                 # DistilBERT LayerNorm eps
ATTN_SCALE = 1.0 / (DH ** 0.5)

assert NH * DH == H


def _gelu(x):
    # TODO(synk): DistilBERT uses exact erf-GELU; tanh approximation used here.
    return jax.nn.gelu(x, approximate=True)


def _ln(x, g, b):
    # Single-pass statistics: one sum and one sum-of-squares lane reduce.
    inv_n = 1.0 / x.shape[-1]
    s = jnp.sum(x, axis=-1, keepdims=True)
    s2 = jnp.sum(x * x, axis=-1, keepdims=True)
    mu = s * inv_n
    var = s2 * inv_n - mu * mu
    return (x - mu) * jax.lax.rsqrt(var + EPS) * g + b


# --------------------------- fused Pallas kernel -----------------------------
def fused_forward_kernel(x_emb_ref, embg_ref, embb_ref,
                         wqkv_ref, bqkv_ref, wo_ref, bo_ref, g1_ref, be1_ref,
                         w1_ref, b1_ref, w2_ref, b2_ref, g2_ref, be2_ref,
                         outw_ref, outb_ref,
                         logits_ref,
                         x_scr):
    """Grid = (batch_tile, layer). One grid step == one transformer block for one
    batch tile. Activations live in x_scr (VMEM, shape (S, H), f32)."""
    layer = pl.program_id(1)

    # ---- layer 0: embedding LayerNorm (emb dropout is identity at inference) ----
    @pl.when(layer == 0)
    def _():
        x_scr[...] = _ln(x_emb_ref[...].astype(jnp.float32),
                         embg_ref[...], embb_ref[...])

    x = x_scr[...]                                                    # (S, H) f32
    xb = x.astype(jnp.bfloat16)

    # ---- multi-head self-attention, heads as einsum batch dim ----
    # Weights arrive pre-split per head: wqkv_ref (3, NH, H, DH), wo_ref (NH, DH, H).
    xh = jnp.broadcast_to(xb, (NH, S, H))                             # (NH, S, H) bf16
    q = jnp.einsum('nsh,nhd->nsd', xh, wqkv_ref[0],
                   preferred_element_type=jnp.float32) + bqkv_ref[0]  # (NH, S, DH)
    k = jnp.einsum('nsh,nhd->nsd', xh, wqkv_ref[1],
                   preferred_element_type=jnp.float32) + bqkv_ref[1]
    v = jnp.einsum('nsh,nhd->nsd', xh, wqkv_ref[2],
                   preferred_element_type=jnp.float32) + bqkv_ref[2]

    sc = jnp.einsum('nqd,nkd->nqk', q.astype(jnp.bfloat16), k.astype(jnp.bfloat16),
                    preferred_element_type=jnp.float32) * ATTN_SCALE  # (NH, S, S)
    sc = sc - jnp.max(sc, axis=-1, keepdims=True)
    p = jnp.exp(sc)
    p = p * pl.reciprocal(jnp.sum(p, axis=-1, keepdims=True), approx=True)
    ctx = jnp.einsum('nqk,nkd->nqd', p.astype(jnp.bfloat16), v.astype(jnp.bfloat16),
                     preferred_element_type=jnp.float32)              # (NH, S, DH)

    # Output projection: head-batched against per-head rows of Wo, then reduce heads.
    # (With H % 128 == 0 flatten ctx to (S, H) and use one full-K matmul instead.)
    attn_h = jnp.einsum('nsd,ndh->nsh', ctx.astype(jnp.bfloat16), wo_ref[...],
                        preferred_element_type=jnp.float32)           # (NH, S, H)
    attn = jnp.sum(attn_h, axis=0) + bo_ref[...]                      # (S, H)

    hdn = _ln(x + attn, g1_ref[...], be1_ref[...])                    # sa_layer_norm

    # ---- feed-forward ----
    # NOTE: at real seq lengths tile this over tokens so the (S, FFN) intermediate
    # stays a few MiB; unnecessary at this toy size.
    f = jnp.dot(hdn.astype(jnp.bfloat16), w1_ref[...],
                preferred_element_type=jnp.float32) + b1_ref[...]     # (S, FFN)
    f = _gelu(f)
    f = jnp.dot(f.astype(jnp.bfloat16), w2_ref[...],
                preferred_element_type=jnp.float32) + b2_ref[...]     # (S, H)
    y = _ln(hdn + f, g2_ref[...], be2_ref[...])                       # output_layer_norm

    x_scr[...] = y                                                    # carry to next layer

    # ---- final layer: CLS pooling + bert_drop(identity) + classifier head ----
    @pl.when(layer == pl.num_programs(1) - 1)
    def _():
        cls = y[0:1, :]                                               # (1, H) CLS row
        logits = jnp.dot(cls.astype(jnp.bfloat16), outw_ref[...],
                         preferred_element_type=jnp.float32) + outb_ref[...]
        logits_ref[...] = logits.astype(logits_ref.dtype)             # lane-dense (1, 128)


# ------------------------- parameters & forward -----------------------------
def init_params(key):
    scale = 0.02

    def dense(k, shape):
        return (scale * jax.random.normal(k, shape)).astype(jnp.float32)

    keys = jax.random.split(key, 9)

    def split_cols(w):   # (L, H, H) -> (L, NH, H, DH): column n*DH+d -> [n, :, d]
        return w.reshape(L, H, NH, DH).transpose(0, 2, 1, 3)

    wq = dense(keys[2], (L, H, H))
    wk = dense(keys[3], (L, H, H))
    wv = dense(keys[4], (L, H, H))
    wo = dense(keys[5], (L, H, H))

    params = {
        'word_emb': dense(keys[0], (VOCAB, H)),
        'pos_emb': dense(keys[1], (S, H)),
        'emb_ln_g': jnp.ones((1, H), jnp.float32),
        'emb_ln_b': jnp.zeros((1, H), jnp.float32),
        # Per-layer weights stacked along a leading L axis (streamed by the grid),
        # stored in bf16 (MXU-native, halves the per-layer DMA bytes).
        # q/k/v weights head-split with heads leading: (L, 3, NH, H, DH).
        'wqkv': jnp.stack([split_cols(wq), split_cols(wk), split_cols(wv)],
                          axis=1).astype(jnp.bfloat16),
        'bqkv': jnp.zeros((L, 3, NH, 1, DH), jnp.float32),
        # Wo rows head-split: (L, NH, DH, H)  (row n*DH+d -> [n, d, :]).
        'wo': wo.reshape(L, NH, DH, H).astype(jnp.bfloat16),
        'bo': jnp.zeros((L, 1, H), jnp.float32),
        'ln1_g': jnp.ones((L, 1, H), jnp.float32),
        'ln1_b': jnp.zeros((L, 1, H), jnp.float32),
        'w1': dense(keys[6], (L, H, FFN)).astype(jnp.bfloat16),
        'b1': jnp.zeros((L, 1, FFN), jnp.float32),
        'w2': dense(keys[7], (L, FFN, H)).astype(jnp.bfloat16),
        'b2': jnp.zeros((L, 1, H), jnp.float32),
        'ln2_g': jnp.ones((L, 1, H), jnp.float32),
        'ln2_b': jnp.zeros((L, 1, H), jnp.float32),
    }
    # self.out = nn.Linear(hidden, num_classes), stored as [in, out]; zero-padded to a
    # lane-dense 128-wide output (logits sliced back outside the kernel).
    out_w = dense(keys[8], (H, NUM_CLASSES))
    out_b = jnp.zeros((1, NUM_CLASSES), jnp.float32)
    params['out_w_pad'] = jnp.pad(out_w, ((0, 0), (0, LANE - NUM_CLASSES))).astype(jnp.bfloat16)
    params['out_b_pad'] = jnp.pad(out_b, ((0, 0), (0, LANE - NUM_CLASSES)))
    return params


def laboro_bert_forward(ids, params):
    # Embedding gather is glue, done in plain JAX; everything else runs in one kernel.
    x_emb = params['word_emb'][ids] + params['pos_emb'][None, :, :]   # (B, S, H) f32

    sq = pl.Squeezed()
    logits_pad = pl.pallas_call(
        fused_forward_kernel,
        out_shape=jax.ShapeDtypeStruct((B, 1, LANE), jnp.float32),
        grid_spec=pltpu.PrefetchScalarGridSpec(
            num_scalar_prefetch=0,
            grid=(B, L),                                              # (batch-parallel, layers)
            in_specs=[
                pl.BlockSpec((sq, S, H), lambda b, l: (b, 0, 0)),           # embeddings (per batch tile)
                pl.BlockSpec((1, H), lambda b, l: (0, 0)),                  # emb LN gamma
                pl.BlockSpec((1, H), lambda b, l: (0, 0)),                  # emb LN beta
                pl.BlockSpec((sq, 3, NH, H, DH), lambda b, l: (l, 0, 0, 0, 0)),  # wqkv (streamed, bf16)
                pl.BlockSpec((sq, 3, NH, 1, DH), lambda b, l: (l, 0, 0, 0, 0)),  # bqkv
                pl.BlockSpec((sq, NH, DH, H), lambda b, l: (l, 0, 0, 0)),   # wo (streamed, bf16)
                pl.BlockSpec((sq, 1, H), lambda b, l: (l, 0, 0)),           # bo
                pl.BlockSpec((sq, 1, H), lambda b, l: (l, 0, 0)),           # ln1_g
                pl.BlockSpec((sq, 1, H), lambda b, l: (l, 0, 0)),           # ln1_b
                pl.BlockSpec((sq, H, FFN), lambda b, l: (l, 0, 0)),         # w1 (streamed, bf16)
                pl.BlockSpec((sq, 1, FFN), lambda b, l: (l, 0, 0)),         # b1
                pl.BlockSpec((sq, FFN, H), lambda b, l: (l, 0, 0)),         # w2 (streamed, bf16)
                pl.BlockSpec((sq, 1, H), lambda b, l: (l, 0, 0)),           # b2
                pl.BlockSpec((sq, 1, H), lambda b, l: (l, 0, 0)),           # ln2_g
                pl.BlockSpec((sq, 1, H), lambda b, l: (l, 0, 0)),           # ln2_b
                pl.BlockSpec((H, LANE), lambda b, l: (0, 0)),               # classifier W (padded, bf16)
                pl.BlockSpec((1, LANE), lambda b, l: (0, 0)),               # classifier b (padded)
            ],
            out_specs=pl.BlockSpec((sq, 1, LANE), lambda b, l: (b, 0, 0)),  # written on last layer
            scratch_shapes=[pltpu.VMEM((S, H), jnp.float32)],               # carried activations
        ),
        compiler_params=pltpu.CompilerParams(
            dimension_semantics=("parallel", "arbitrary"),
            vmem_limit_bytes=48 * 1024 * 1024),
    )(x_emb, params['emb_ln_g'], params['emb_ln_b'],
      params['wqkv'], params['bqkv'], params['wo'], params['bo'],
      params['ln1_g'], params['ln1_b'],
      params['w1'], params['b1'], params['w2'], params['b2'],
      params['ln2_g'], params['ln2_b'],
      params['out_w_pad'], params['out_b_pad'])

    return logits_pad[:, 0, :NUM_CLASSES]


if __name__ == "__main__":
    key = jax.random.PRNGKey(0)
    k_param, k_ids = jax.random.split(key)
    params = init_params(k_param)
    ids = jax.random.randint(k_ids, (B, S), 0, VOCAB, dtype=jnp.int32)

    logits = laboro_bert_forward(ids, params)
    jax.block_until_ready(logits)
    assert logits.shape == (B, NUM_CLASSES), logits.shape
    print("KERNEL_OK")
</pallas_src>

<mosaic_0001>
module attributes {stable_mosaic.version = 11 : i64} {
  func.func @fused_forward_kernel(%arg0: i32, %arg1: i32, %arg2: memref<1x8x64xf32, #tpu.memory_space<vmem>>, %arg3: memref<1x64xf32, #tpu.memory_space<vmem>>, %arg4: memref<1x64xf32, #tpu.memory_space<vmem>>, %arg5: memref<1x3x4x64x16xbf16, #tpu.memory_space<vmem>>, %arg6: memref<1x3x4x1x16xf32, #tpu.memory_space<vmem>>, %arg7: memref<1x4x16x64xbf16, #tpu.memory_space<vmem>>, %arg8: memref<1x1x64xf32, #tpu.memory_space<vmem>>, %arg9: memref<1x1x64xf32, #tpu.memory_space<vmem>>, %arg10: memref<1x1x64xf32, #tpu.memory_space<vmem>>, %arg11: memref<1x64x256xbf16, #tpu.memory_space<vmem>>, %arg12: memref<1x1x256xf32, #tpu.memory_space<vmem>>, %arg13: memref<1x256x64xbf16, #tpu.memory_space<vmem>>, %arg14: memref<1x1x64xf32, #tpu.memory_space<vmem>>, %arg15: memref<1x1x64xf32, #tpu.memory_space<vmem>>, %arg16: memref<1x1x64xf32, #tpu.memory_space<vmem>>, %arg17: memref<64x128xbf16, #tpu.memory_space<vmem>>, %arg18: memref<1x128xf32, #tpu.memory_space<vmem>>, %arg19: memref<1x1x128xf32, #tpu.memory_space<vmem>>, %arg20: memref<8x64xf32, #tpu.memory_space<vmem>>) attributes {dimension_semantics = [#tpu.dimension_semantics<parallel>, #tpu.dimension_semantics<arbitrary>], iteration_bounds = array<i64: 2, 2>, scalar_prefetch = 0 : i64, scratch_operands = 1 : i64, tpu.core_type = #tpu.core_type<tc>, window_params = [{transform_indices = @transform_0, window_bounds = array<i64: 1, 8, 64>}, {pipeline_mode = #tpu.pipeline_mode<synchronous>, transform_indices = @transform_1, window_bounds = array<i64: 1, 64>}, {pipeline_mode = #tpu.pipeline_mode<synchronous>, transform_indices = @transform_2, window_bounds = array<i64: 1, 64>}, {transform_indices = @transform_3, window_bounds = array<i64: 1, 3, 4, 64, 16>}, {transform_indices = @transform_4, window_bounds = array<i64: 1, 3, 4, 1, 16>}, {transform_indices = @transform_5, window_bounds = array<i64: 1, 4, 16, 64>}, {transform_indices = @transform_6, window_bounds = array<i64: 1, 1, 64>}, {transform_indices = @transform_7, window_bounds = array<i64: 1, 1, 64>}, {transform_indices = @transform_8, window_bounds = array<i64: 1, 1, 64>}, {transform_indices = @transform_9, window_bounds = array<i64: 1, 64, 256>}, {transform_indices = @transform_10, window_bounds = array<i64: 1, 1, 256>}, {transform_indices = @transform_11, window_bounds = array<i64: 1, 256, 64>}, {transform_indices = @transform_12, window_bounds = array<i64: 1, 1, 64>}, {transform_indices = @transform_13, window_bounds = array<i64: 1, 1, 64>}, {transform_indices = @transform_14, window_bounds = array<i64: 1, 1, 64>}, {pipeline_mode = #tpu.pipeline_mode<synchronous>, transform_indices = @transform_15, window_bounds = array<i64: 64, 128>}, {pipeline_mode = #tpu.pipeline_mode<synchronous>, transform_indices = @transform_16, window_bounds = array<i64: 1, 128>}, {transform_indices = @transform_17, window_bounds = array<i64: 1, 1, 128>}]} {
    %c0_i32 = arith.constant 0 : i32
    %0 = arith.cmpi eq, %arg1, %c0_i32 : i32
    %1 = arith.extui %0 : i1 to i32
    %c0_i32_0 = arith.constant 0 : i32
    %2 = arith.cmpi ne, %1, %c0_i32_0 : i32
    scf.if %2 {
      %c0_89 = arith.constant 0 : index
      %c0_90 = arith.constant 0 : index
      %c0_91 = arith.constant 0 : index
      %142 = vector.load %arg2[%c0_89, %c0_90, %c0_91] : memref<1x8x64xf32, #tpu.memory_space<vmem>>, vector<1x8x64xf32>
      %143 = vector.shape_cast %142 : vector<1x8x64xf32> to vector<8x64xf32>
      %c0_92 = arith.constant 0 : index
      %c0_93 = arith.constant 0 : index
      %144 = vector.load %arg3[%c0_92, %c0_93] : memref<1x64xf32, #tpu.memory_space<vmem>>, vector<1x64xf32>
      %c0_94 = arith.constant 0 : index
      %c0_95 = arith.constant 0 : index
      %145 = vector.load %arg4[%c0_94, %c0_95] : memref<1x64xf32, #tpu.memory_space<vmem>>, vector<1x64xf32>
      %cst_96 = arith.constant dense<0.000000e+00> : vector<8xf32>
      %146 = vector.multi_reduction <add>, %143, %cst_96 [1] : vector<8x64xf32> to vector<8xf32>
      %147 = vector.shape_cast %146 : vector<8xf32> to vector<8x1xf32>
      %148 = arith.mulf %143, %143 : vector<8x64xf32>
      %cst_97 = arith.constant dense<0.000000e+00> : vector<8xf32>
      %149 = vector.multi_reduction <add>, %148, %cst_97 [1] : vector<8x64xf32> to vector<8xf32>
      %150 = vector.shape_cast %149 : vector<8xf32> to vector<8x1xf32>
      %cst_98 = arith.constant 1.562500e-02 : f32
      %151 = vector.broadcast %cst_98 : f32 to vector<8x1xf32>
      %152 = arith.mulf %147, %151 : vector<8x1xf32>
      %cst_99 = arith.constant 1.562500e-02 : f32
      %153 = vector.broadcast %cst_99 : f32 to vector<8x1xf32>
      %154 = arith.mulf %150, %153 : vector<8x1xf32>
      %155 = arith.mulf %152, %152 : vector<8x1xf32>
      %156 = arith.subf %154, %155 : vector<8x1xf32>
      %157 = vector.broadcast %152 : vector<8x1xf32> to vector<8x64xf32>
      %158 = arith.subf %143, %157 : vector<8x64xf32>
      %cst_100 = arith.constant 9.99999996E-13 : f32
      %159 = vector.broadcast %cst_100 : f32 to vector<8x1xf32>
      %160 = arith.addf %156, %159 : vector<8x1xf32>
      %161 = math.rsqrt %160 : vector<8x1xf32>
      %162 = vector.broadcast %161 : vector<8x1xf32> to vector<8x64xf32>
      %163 = arith.mulf %158, %162 : vector<8x64xf32>
      %164 = vector.broadcast %144 : vector<1x64xf32> to vector<8x64xf32>
      %165 = arith.mulf %163, %164 : vector<8x64xf32>
      %166 = vector.broadcast %145 : vector<1x64xf32> to vector<8x64xf32>
      %167 = arith.addf %165, %166 : vector<8x64xf32>
      %c0_101 = arith.constant 0 : index
      %c0_102 = arith.constant 0 : index
      %168 = vector.load %arg20[%c0_101, %c0_102] : memref<8x64xf32, #tpu.memory_space<vmem>>, vector<8x64xf32>
      tpu.vector_store %arg20[%c0_101, %c0_102], %167 {strides = array<i32>} : memref<8x64xf32, #tpu.memory_space<vmem>>, vector<8x64xf32>,
    } else {
    }
    %c0 = arith.constant 0 : index
    %c0_1 = arith.constant 0 : index
    %3 = vector.load %arg20[%c0, %c0_1] : memref<8x64xf32, #tpu.memory_space<vmem>>, vector<8x64xf32>
    %4 = arith.truncf %3 : vector<8x64xf32> to vector<8x64xbf16>
    %5 = vector.shape_cast %4 : vector<8x64xbf16> to vector<1x8x64xbf16>
    %6 = vector.broadcast %5 : vector<1x8x64xbf16> to vector<4x8x64xbf16>
    %c0_2 = arith.constant 0 : index
    %c0_3 = arith.constant 0 : index
    %c0_4 = arith.constant 0 : index
    %c0_5 = arith.constant 0 : index
    %c0_6 = arith.constant 0 : index
    %7 = vector.load %arg5[%c0_2, %c0_3, %c0_4, %c0_5, %c0_6] : memref<1x3x4x64x16xbf16, #tpu.memory_space<vmem>>, vector<1x1x4x64x16xbf16>
    %8 = vector.shape_cast %7 : vector<1x1x4x64x16xbf16> to vector<4x64x16xbf16>
    "tpu.trace_start"() <{level = 10 : i32, message = "nsh,nhd->nsd"}> : () -> ()
    %cst = arith.constant dense<0.000000e+00> : vector<4x8x16xf32>
    %9 = tpu.matmul %6, %8, %cst {dimension_numbers = #tpu.dot_dimension_numbers<[2], [1], [1], [2], [0, 0, 0, 1, 1, 2], [0], [0]>} : vector<4x8x64xbf16>, vector<4x64x16xbf16>, vector<4x8x16xf32> -> vector<4x8x16xf32>
    "tpu.trace_stop"() : () -> ()
    %c0_7 = arith.constant 0 : index
    %c0_8 = arith.constant 0 : index
    %c0_9 = arith.constant 0 : index
    %c0_10 = arith.constant 0 : index
    %c0_11 = arith.constant 0 : index
    %10 = vector.load %arg6[%c0_7, %c0_8, %c0_9, %c0_10, %c0_11] : memref<1x3x4x1x16xf32, #tpu.memory_space<vmem>>, vector<1x1x4x1x16xf32>
    %11 = vector.shape_cast %10 : vector<1x1x4x1x16xf32> to vector<4x1x16xf32>
    %12 = vector.broadcast %11 : vector<4x1x16xf32> to vector<4x8x16xf32>
    %13 = arith.addf %9, %12 : vector<4x8x16xf32>
    %c0_12 = arith.constant 0 : index
    %c1 = arith.constant 1 : index
    %c0_13 = arith.constant 0 : index
    %c0_14 = arith.constant 0 : index
    %c0_15 = arith.constant 0 : index
    %14 = vector.load %arg5[%c0_12, %c1, %c0_13, %c0_14, %c0_15] : memref<1x3x4x64x16xbf16, #tpu.memory_space<vmem>>, vector<1x1x4x64x16xbf16>
    %15 = vector.shape_cast %14 : vector<1x1x4x64x16xbf16> to vector<4x64x16xbf16>
    "tpu.trace_start"() <{level = 10 : i32, message = "nsh,nhd->nsd"}> : () -> ()
    %cst_16 = arith.constant dense<0.000000e+00> : vector<4x8x16xf32>
    %16 = tpu.matmul %6, %15, %cst_16 {dimension_numbers = #tpu.dot_dimension_numbers<[2], [1], [1], [2], [0, 0, 0, 1, 1, 2], [0], [0]>} : vector<4x8x64xbf16>, vector<4x64x16xbf16>, vector<4x8x16xf32> -> vector<4x8x16xf32>
    "tpu.trace_stop"() : () -> ()
    %c0_17 = arith.constant 0 : index
    %c1_18 = arith.constant 1 : index
    %c0_19 = arith.constant 0 : index
    %c0_20 = arith.constant 0 : index
    %c0_21 = arith.constant 0 : index
    %17 = vector.load %arg6[%c0_17, %c1_18, %c0_19, %c0_20, %c0_21] : memref<1x3x4x1x16xf32, #tpu.memory_space<vmem>>, vector<1x1x4x1x16xf32>
    %18 = vector.shape_cast %17 : vector<1x1x4x1x16xf32> to vector<4x1x16xf32>
    %19 = vector.broadcast %18 : vector<4x1x16xf32> to vector<4x8x16xf32>
    %20 = arith.addf %16, %19 : vector<4x8x16xf32>
    %c0_22 = arith.constant 0 : index
    %c2 = arith.constant 2 : index
    %c0_23 = arith.constant 0 : index
    %c0_24 = arith.constant 0 : index
    %c0_25 = arith.constant 0 : index
    %21 = vector.load %arg5[%c0_22, %c2, %c0_23, %c0_24, %c0_25] : memref<1x3x4x64x16xbf16, #tpu.memory_space<vmem>>, vector<1x1x4x64x16xbf16>
    %22 = vector.shape_cast %21 : vector<1x1x4x64x16xbf16> to vector<4x64x16xbf16>
    "tpu.trace_start"() <{level = 10 : i32, message = "nsh,nhd->nsd"}> : () -> ()
    %cst_26 = arith.constant dense<0.000000e+00> : vector<4x8x16xf32>
    %23 = tpu.matmul %6, %22, %cst_26 {dimension_numbers = #tpu.dot_dimension_numbers<[2], [1], [1], [2], [0, 0, 0, 1, 1, 2], [0], [0]>} : vector<4x8x64xbf16>, vector<4x64x16xbf16>, vector<4x8x16xf32> -> vector<4x8x16xf32>
    "tpu.trace_stop"() : () -> ()
    %c0_27 = arith.constant 0 : index
    %c2_28 = arith.constant 2 : index
    %c0_29 = arith.constant 0 : index
    %c0_30 = arith.constant 0 : index
    %c0_31 = arith.constant 0 : index
    %24 = vector.load %arg6[%c0_27, %c2_28, %c0_29, %c0_30, %c0_31] : memref<1x3x4x1x16xf32, #tpu.memory_space<vmem>>, vector<1x1x4x1x16xf32>
    %25 = vector.shape_cast %24 : vector<1x1x4x1x16xf32> to vector<4x1x16xf32>
    %26 = vector.broadcast %25 : vector<4x1x16xf32> to vector<4x8x16xf32>
    %27 = arith.addf %23, %26 : vector<4x8x16xf32>
    %28 = arith.truncf %13 : vector<4x8x16xf32> to vector<4x8x16xbf16>
    %29 = arith.truncf %20 : vector<4x8x16xf32> to vector<4x8x16xbf16>
    "tpu.trace_start"() <{level = 10 : i32, message = "nqd,nkd->nqk"}> : () -> ()
    %cst_32 = arith.constant dense<0.000000e+00> : vector<4x8x8xf32>
    %30 = tpu.matmul %28, %29, %cst_32 {dimension_numbers = #tpu.dot_dimension_numbers<[2], [2], [1], [1], [0, 0, 0, 1, 1, 1], [0], [0]>} : vector<4x8x16xbf16>, vector<4x8x16xbf16>, vector<4x8x8xf32> -> vector<4x8x8xf32>
    "tpu.trace_stop"() : () -> ()
    %cst_33 = arith.constant 2.500000e-01 : f32
    %31 = vector.broadcast %cst_33 : f32 to vector<4x8x8xf32>
    %32 = arith.mulf %30, %31 : vector<4x8x8xf32>
    %cst_34 = arith.constant dense<0xFF800000> : vector<4x8xf32>
    %33 = vector.multi_reduction <maximumf>, %32, %cst_34 [2] : vector<4x8x8xf32> to vector<4x8xf32>
    %34 = vector.shape_cast %33 : vector<4x8xf32> to vector<4x8x1xf32>
    %35 = vector.broadcast %34 : vector<4x8x1xf32> to vector<4x8x8xf32>
    %36 = arith.subf %32, %35 : vector<4x8x8xf32>
    %37 = math.exp %36 : vector<4x8x8xf32>
    %cst_35 = arith.constant dense<0.000000e+00> : vector<4x8xf32>
    %38 = vector.multi_reduction <add>, %37, %cst_35 [2] : vector<4x8x8xf32> to vector<4x8xf32>
    %39 = vector.shape_cast %38 : vector<4x8xf32> to vector<4x8x1xf32>
    %40 = tpu.reciprocal %39 {approx = true} : vector<4x8x1xf32> -> vector<4x8x1xf32>
    %41 = vector.broadcast %40 : vector<4x8x1xf32> to vector<4x8x8xf32>
    %42 = arith.mulf %37, %41 : vector<4x8x8xf32>
    %43 = arith.truncf %42 : vector<4x8x8xf32> to vector<4x8x8xbf16>
    %44 = arith.truncf %27 : vector<4x8x16xf32> to vector<4x8x16xbf16>
    "tpu.trace_start"() <{level = 10 : i32, message = "nqk,nkd->nqd"}> : () -> ()
    %cst_36 = arith.constant dense<0.000000e+00> : vector<4x8x16xf32>
    %45 = tpu.matmul %43, %44, %cst_36 {dimension_numbers = #tpu.dot_dimension_numbers<[2], [1], [1], [2], [0, 0, 0, 1, 1, 2], [0], [0]>} : vector<4x8x8xbf16>, vector<4x8x16xbf16>, vector<4x8x16xf32> -> vector<4x8x16xf32>
    "tpu.trace_stop"() : () -> ()
    %46 = arith.truncf %45 : vector<4x8x16xf32> to vector<4x8x16xbf16>
    %c0_37 = arith.constant 0 : index
    %c0_38 = arith.constant 0 : index
    %c0_39 = arith.constant 0 : index
    %c0_40 = arith.constant 0 : index
    %47 = vector.load %arg7[%c0_37, %c0_38, %c0_39, %c0_40] : memref<1x4x16x64xbf16, #tpu.memory_space<vmem>>, vector<1x4x16x64xbf16>
    %48 = vector.shape_cast %47 : vector<1x4x16x64xbf16> to vector<4x16x64xbf16>
    "tpu.trace_start"() <{level = 10 : i32, message = "nsd,ndh->nsh"}> : () -> ()
    %cst_41 = arith.constant dense<0.000000e+00> : vector<4x8x64xf32>
    %49 = tpu.matmul %46, %48, %cst_41 {dimension_numbers = #tpu.dot_dimension_numbers<[2], [1], [1], [2], [0, 0, 0, 1, 1, 2], [0], [0]>} : vector<4x8x16xbf16>, vector<4x16x64xbf16>, vector<4x8x64xf32> -> vector<4x8x64xf32>
    "tpu.trace_stop"() : () -> ()
    %cst_42 = arith.constant dense<0.000000e+00> : vector<8x64xf32>
    %50 = vector.multi_reduction <add>, %49, %cst_42 [0] : vector<4x8x64xf32> to vector<8x64xf32>
    %c0_43 = arith.constant 0 : index
    %c0_44 = arith.constant 0 : index
    %c0_45 = arith.constant 0 : index
    %51 = vector.load %arg8[%c0_43, %c0_44, %c0_45] : memref<1x1x64xf32, #tpu.memory_space<vmem>>, vector<1x1x64xf32>
    %52 = vector.shape_cast %51 : vector<1x1x64xf32> to vector<1x64xf32>
    %53 = vector.broadcast %52 : vector<1x64xf32> to vector<8x64xf32>
    %54 = arith.addf %50, %53 : vector<8x64xf32>
    %55 = arith.addf %3, %54 : vector<8x64xf32>
    %c0_46 = arith.constant 0 : index
    %c0_47 = arith.constant 0 : index
    %c0_48 = arith.constant 0 : index
    %56 = vector.load %arg9[%c0_46, %c0_47, %c0_48] : memref<1x1x64xf32, #tpu.memory_space<vmem>>, vector<1x1x64xf32>
    %57 = vector.shape_cast %56 : vector<1x1x64xf32> to vector<1x64xf32>
    %c0_49 = arith.constant 0 : index
    %c0_50 = arith.constant 0 : index
    %c0_51 = arith.constant 0 : index
    %58 = vector.load %arg10[%c0_49, %c0_50, %c0_51] : memref<1x1x64xf32, #tpu.memory_space<vmem>>, vector<1x1x64xf32>
    %59 = vector.shape_cast %58 : vector<1x1x64xf32> to vector<1x64xf32>
    %cst_52 = arith.constant dense<0.000000e+00> : vector<8xf32>
    %60 = vector.multi_reduction <add>, %55, %cst_52 [1] : vector<8x64xf32> to vector<8xf32>
    %61 = vector.shape_cast %60 : vector<8xf32> to vector<8x1xf32>
    %62 = arith.mulf %55, %55 : vector<8x64xf32>
    %cst_53 = arith.constant dense<0.000000e+00> : vector<8xf32>
    %63 = vector.multi_reduction <add>, %62, %cst_53 [1] : vector<8x64xf32> to vector<8xf32>
    %64 = vector.shape_cast %63 : vector<8xf32> to vector<8x1xf32>
    %cst_54 = arith.constant 1.562500e-02 : f32
    %65 = vector.broadcast %cst_54 : f32 to vector<8x1xf32>
    %66 = arith.mulf %61, %65 : vector<8x1xf32>
    %cst_55 = arith.constant 1.562500e-02 : f32
    %67 = vector.broadcast %cst_55 : f32 to vector<8x1xf32>
    %68 = arith.mulf %64, %67 : vector<8x1xf32>
    %69 = arith.mulf %66, %66 : vector<8x1xf32>
    %70 = arith.subf %68, %69 : vector<8x1xf32>
    %71 = vector.broadcast %66 : vector<8x1xf32> to vector<8x64xf32>
    %72 = arith.subf %55, %71 : vector<8x64xf32>
    %cst_56 = arith.constant 9.99999996E-13 : f32
    %73 = vector.broadcast %cst_56 : f32 to vector<8x1xf32>
    %74 = arith.addf %70, %73 : vector<8x1xf32>
    %75 = math.rsqrt %74 : vector<8x1xf32>
    %76 = vector.broadcast %75 : vector<8x1xf32> to vector<8x64xf32>
    %77 = arith.mulf %72, %76 : vector<8x64xf32>
    %78 = vector.broadcast %57 : vector<1x64xf32> to vector<8x64xf32>
    %79 = arith.mulf %77, %78 : vector<8x64xf32>
    %80 = vector.broadcast %59 : vector<1x64xf32> to vector<8x64xf32>
    %81 = arith.addf %79, %80 : vector<8x64xf32>
    %82 = arith.truncf %81 : vector<8x64xf32> to vector<8x64xbf16>
    %c0_57 = arith.constant 0 : index
    %c0_58 = arith.constant 0 : index
    %c0_59 = arith.constant 0 : index
    %83 = vector.load %arg11[%c0_57, %c0_58, %c0_59] : memref<1x64x256xbf16, #tpu.memory_space<vmem>>, vector<1x64x256xbf16>
    %84 = vector.shape_cast %83 : vector<1x64x256xbf16> to vector<64x256xbf16>
    %cst_60 = arith.constant dense<0.000000e+00> : vector<8x256xf32>
    %85 = tpu.matmul %82, %84, %cst_60 {dimension_numbers = #tpu.dot_dimension_numbers<[1], [0], [0], [1], [0, 0, 1, 1], [], []>} : vector<8x64xbf16>, vector<64x256xbf16>, vector<8x256xf32> -> vector<8x256xf32>
    %c0_61 = arith.constant 0 : index
    %c0_62 = arith.constant 0 : index
    %c0_63 = arith.constant 0 : index
    %86 = vector.load %arg12[%c0_61, %c0_62, %c0_63] : memref<1x1x256xf32, #tpu.memory_space<vmem>>, vector<1x1x256xf32>
    %87 = vector.shape_cast %86 : vector<1x1x256xf32> to vector<1x256xf32>
    %88 = vector.broadcast %87 : vector<1x256xf32> to vector<8x256xf32>
    %89 = arith.addf %85, %88 : vector<8x256xf32>
    %90 = arith.mulf %89, %89 : vector<8x256xf32>
    %91 = arith.mulf %89, %90 : vector<8x256xf32>
    %cst_64 = arith.constant 4.471500e-02 : f32
    %92 = vector.broadcast %cst_64 : f32 to vector<8x256xf32>
    %93 = arith.mulf %92, %91 : vector<8x256xf32>
    %94 = arith.addf %89, %93 : vector<8x256xf32>
    %cst_65 = arith.constant 0.797884583 : f32
    %95 = vector.broadcast %cst_65 : f32 to vector<8x256xf32>
    %96 = arith.mulf %95, %94 : vector<8x256xf32>
    %97 = math.tanh %96 : vector<8x256xf32>
    %cst_66 = arith.constant 1.000000e+00 : f32
    %98 = vector.broadcast %cst_66 : f32 to vector<8x256xf32>
    %99 = arith.addf %98, %97 : vector<8x256xf32>
    %cst_67 = arith.constant 5.000000e-01 : f32
    %100 = vector.broadcast %cst_67 : f32 to vector<8x256xf32>
    %101 = arith.mulf %100, %99 : vector<8x256xf32>
    %102 = arith.mulf %89, %101 : vector<8x256xf32>
    %103 = arith.truncf %102 : vector<8x256xf32> to vector<8x256xbf16>
    %c0_68 = arith.constant 0 : index
    %c0_69 = arith.constant 0 : index
    %c0_70 = arith.constant 0 : index
    %104 = vector.load %arg13[%c0_68, %c0_69, %c0_70] : memref<1x256x64xbf16, #tpu.memory_space<vmem>>, vector<1x256x64xbf16>
    %105 = vector.shape_cast %104 : vector<1x256x64xbf16> to vector<256x64xbf16>
    %cst_71 = arith.constant dense<0.000000e+00> : vector<8x64xf32>
    %106 = tpu.matmul %103, %105, %cst_71 {dimension_numbers = #tpu.dot_dimension_numbers<[1], [0], [0], [1], [0, 0, 1, 1], [], []>} : vector<8x256xbf16>, vector<256x64xbf16>, vector<8x64xf32> -> vector<8x64xf32>
    %c0_72 = arith.constant 0 : index
    %c0_73 = arith.constant 0 : index
    %c0_74 = arith.constant 0 : index
    %107 = vector.load %arg14[%c0_72, %c0_73, %c0_74] : memref<1x1x64xf32, #tpu.memory_space<vmem>>, vector<1x1x64xf32>
    %108 = vector.shape_cast %107 : vector<1x1x64xf32> to vector<1x64xf32>
    %109 = vector.broadcast %108 : vector<1x64xf32> to vector<8x64xf32>
    %110 = arith.addf %106, %109 : vector<8x64xf32>
    %111 = arith.addf %81, %110 : vector<8x64xf32>
    %c0_75 = arith.constant 0 : index
    %c0_76 = arith.constant 0 : index
    %c0_77 = arith.constant 0 : index
    %112 = vector.load %arg15[%c0_75, %c0_76, %c0_77] : memref<1x1x64xf32, #tpu.memory_space<vmem>>, vector<1x1x64xf32>
    %113 = vector.shape_cast %112 : vector<1x1x64xf32> to vector<1x64xf32>
    %c0_78 = arith.constant 0 : index
    %c0_79 = arith.constant 0 : index
    %c0_80 = arith.constant 0 : index
    %114 = vector.load %arg16[%c0_78, %c0_79, %c0_80] : memref<1x1x64xf32, #tpu.memory_space<vmem>>, vector<1x1x64xf32>
    %115 = vector.shape_cast %114 : vector<1x1x64xf32> to vector<1x64xf32>
    %cst_81 = arith.constant dense<0.000000e+00> : vector<8xf32>
    %116 = vector.multi_reduction <add>, %111, %cst_81 [1] : vector<8x64xf32> to vector<8xf32>
    %117 = vector.shape_cast %116 : vector<8xf32> to vector<8x1xf32>
    %118 = arith.mulf %111, %111 : vector<8x64xf32>
    %cst_82 = arith.constant dense<0.000000e+00> : vector<8xf32>
    %119 = vector.multi_reduction <add>, %118, %cst_82 [1] : vector<8x64xf32> to vector<8xf32>
    %120 = vector.shape_cast %119 : vector<8xf32> to vector<8x1xf32>
    %cst_83 = arith.constant 1.562500e-02 : f32
    %121 = vector.broadcast %cst_83 : f32 to vector<8x1xf32>
    %122 = arith.mulf %117, %121 : vector<8x1xf32>
    %cst_84 = arith.constant 1.562500e-02 : f32
    %123 = vector.broadcast %cst_84 : f32 to vector<8x1xf32>
    %124 = arith.mulf %120, %123 : vector<8x1xf32>
    %125 = arith.mulf %122, %122 : vector<8x1xf32>
    %126 = arith.subf %124, %125 : vector<8x1xf32>
    %127 = vector.broadcast %122 : vector<8x1xf32> to vector<8x64xf32>
    %128 = arith.subf %111, %127 : vector<8x64xf32>
    %cst_85 = arith.constant 9.99999996E-13 : f32
    %129 = vector.broadcast %cst_85 : f32 to vector<8x1xf32>
    %130 = arith.addf %126, %129 : vector<8x1xf32>
    %131 = math.rsqrt %130 : vector<8x1xf32>
    %132 = vector.broadcast %131 : vector<8x1xf32> to vector<8x64xf32>
    %133 = arith.mulf %128, %132 : vector<8x64xf32>
    %134 = vector.broadcast %113 : vector<1x64xf32> to vector<8x64xf32>
    %135 = arith.mulf %133, %134 : vector<8x64xf32>
    %136 = vector.broadcast %115 : vector<1x64xf32> to vector<8x64xf32>
    %137 = arith.addf %135, %136 : vector<8x64xf32>
    %c0_86 = arith.constant 0 : index
    %c0_87 = arith.constant 0 : index
    %138 = vector.load %arg20[%c0_86, %c0_87] : memref<8x64xf32, #tpu.memory_space<vmem>>, vector<8x64xf32>
    tpu.vector_store %arg20[%c0_86, %c0_87], %137 {strides = array<i32>} : memref<8x64xf32, #tpu.memory_space<vmem>>, vector<8x64xf32>,
    %c1_i32 = arith.constant 1 : i32
    %139 = arith.cmpi eq, %arg1, %c1_i32 : i32
    %140 = arith.extui %139 : i1 to i32
    %c0_i32_88 = arith.constant 0 : i32
    %141 = arith.cmpi ne, %140, %c0_i32_88 : i32
    scf.if %141 {
      %142 = vector.extract_strided_slice %137 {offsets = [0, 0], sizes = [1, 64], strides = [1, 1]} : vector<8x64xf32> to vector<1x64xf32>
      %143 = arith.truncf %142 : vector<1x64xf32> to vector<1x64xbf16>
      %c0_89 = arith.constant 0 : index
      %c0_90 = arith.constant 0 : index
      %144 = vector.load %arg17[%c0_89, %c0_90] : memref<64x128xbf16, #tpu.memory_space<vmem>>, vector<64x128xbf16>
      %cst_91 = arith.constant dense<0.000000e+00> : vector<1x128xf32>
      %145 = tpu.matmul %143, %144, %cst_91 {dimension_numbers = #tpu.dot_dimension_numbers<[1], [0], [0], [1], [0, 0, 1, 1], [], []>} : vector<1x64xbf16>, vector<64x128xbf16>, vector<1x128xf32> -> vector<1x128xf32>
      %c0_92 = arith.constant 0 : index
      %c0_93 = arith.constant 0 : index
      %146 = vector.load %arg18[%c0_92, %c0_93] : memref<1x128xf32, #tpu.memory_space<vmem>>, vector<1x128xf32>
      %147 = arith.addf %145, %146 : vector<1x128xf32>
      %c0_94 = arith.constant 0 : index
      %c0_95 = arith.constant 0 : index
      %c0_96 = arith.constant 0 : index
      %148 = vector.load %arg19[%c0_94, %c0_95, %c0_96] : memref<1x1x128xf32, #tpu.memory_space<vmem>>, vector<1x1x128xf32>
      %149 = vector.shape_cast %148 : vector<1x1x128xf32> to vector<1x128xf32>
      %150 = vector.shape_cast %147 : vector<1x128xf32> to vector<1x1x128xf32>
      tpu.vector_store %arg19[%c0_94, %c0_95, %c0_96], %150 {strides = array<i32>} : memref<1x1x128xf32, #tpu.memory_space<vmem>>, vector<1x1x128xf32>,
    } else {
    }
    return
  }
  func.func @transform_0(%arg0: i32, %arg1: i32) -> (i32, i32, i32) {
    %c0_i32 = arith.constant 0 : i32
    %c0_i32_0 = arith.constant 0 : i32
    %c0_i32_1 = arith.constant 0 : i32
    return %arg0, %c0_i32, %c0_i32_0 : i32, i32, i32
  }
  func.func @transform_1(%arg0: i32, %arg1: i32) -> (i32, i32) {
    %c0_i32 = arith.constant 0 : i32
    %c0_i32_0 = arith.constant 0 : i32
    %c0_i32_1 = arith.constant 0 : i32
    return %c0_i32, %c0_i32_0 : i32, i32
  }
  func.func @transform_2(%arg0: i32, %arg1: i32) -> (i32, i32) {
    %c0_i32 = arith.constant 0 : i32
    %c0_i32_0 = arith.constant 0 : i32
    %c0_i32_1 = arith.constant 0 : i32
    return %c0_i32, %c0_i32_0 : i32, i32
  }
  func.func @transform_3(%arg0: i32, %arg1: i32) -> (i32, i32, i32, i32, i32) {
    %c0_i32 = arith.constant 0 : i32
    %c0_i32_0 = arith.constant 0 : i32
    %c0_i32_1 = arith.constant 0 : i32
    %c0_i32_2 = arith.constant 0 : i32
    %c0_i32_3 = arith.constant 0 : i32
    return %arg1, %c0_i32, %c0_i32_0, %c0_i32_1, %c0_i32_2 : i32, i32, i32, i32, i32
  }
  func.func @transform_4(%arg0: i32, %arg1: i32) -> (i32, i32, i32, i32, i32) {
    %c0_i32 = arith.constant 0 : i32
    %c0_i32_0 = arith.constant 0 : i32
    %c0_i32_1 = arith.constant 0 : i32
    %c0_i32_2 = arith.constant 0 : i32
    %c0_i32_3 = arith.constant 0 : i32
    return %arg1, %c0_i32, %c0_i32_0, %c0_i32_1, %c0_i32_2 : i32, i32, i32, i32, i32
  }
  func.func @transform_5(%arg0: i32, %arg1: i32) -> (i32, i32, i32, i32) {
    %c0_i32 = arith.constant 0 : i32
    %c0_i32_0 = arith.constant 0 : i32
    %c0_i32_1 = arith.constant 0 : i32
    %c0_i32_2 = arith.constant 0 : i32
    return %arg1, %c0_i32, %c0_i32_0, %c0_i32_1 : i32, i32, i32, i32
  }
  func.func @transform_6(%arg0: i32, %arg1: i32) -> (i32, i32, i32) {
    %c0_i32 = arith.constant 0 : i32
    %c0_i32_0 = arith.constant 0 : i32
    %c0_i32_1 = arith.constant 0 : i32
    return %arg1, %c0_i32, %c0_i32_0 : i32, i32, i32
  }
  func.func @transform_7(%arg0: i32, %arg1: i32) -> (i32, i32, i32) {
    %c0_i32 = arith.constant 0 : i32
    %c0_i32_0 = arith.constant 0 : i32
    %c0_i32_1 = arith.constant 0 : i32
    return %arg1, %c0_i32, %c0_i32_0 : i32, i32, i32
  }
  func.func @transform_8(%arg0: i32, %arg1: i32) -> (i32, i32, i32) {
    %c0_i32 = arith.constant 0 : i32
    %c0_i32_0 = arith.constant 0 : i32
    %c0_i32_1 = arith.constant 0 : i32
    return %arg1, %c0_i32, %c0_i32_0 : i32, i32, i32
  }
  func.func @transform_9(%arg0: i32, %arg1: i32) -> (i32, i32, i32) {
    %c0_i32 = arith.constant 0 : i32
    %c0_i32_0 = arith.constant 0 : i32
    %c0_i32_1 = arith.constant 0 : i32
    return %arg1, %c0_i32, %c0_i32_0 : i32, i32, i32
  }
  func.func @transform_10(%arg0: i32, %arg1: i32) -> (i32, i32, i32) {
    %c0_i32 = arith.constant 0 : i32
    %c0_i32_0 = arith.constant 0 : i32
    %c0_i32_1 = arith.constant 0 : i32
    return %arg1, %c0_i32, %c0_i32_0 : i32, i32, i32
  }
  func.func @transform_11(%arg0: i32, %arg1: i32) -> (i32, i32, i32) {
    %c0_i32 = arith.constant 0 : i32
    %c0_i32_0 = arith.constant 0 : i32
    %c0_i32_1 = arith.constant 0 : i32
    return %arg1, %c0_i32, %c0_i32_0 : i32, i32, i32
  }
  func.func @transform_12(%arg0: i32, %arg1: i32) -> (i32, i32, i32) {
    %c0_i32 = arith.constant 0 : i32
    %c0_i32_0 = arith.constant 0 : i32
    %c0_i32_1 = arith.constant 0 : i32
    return %arg1, %c0_i32, %c0_i32_0 : i32, i32, i32
  }
  func.func @transform_13(%arg0: i32, %arg1: i32) -> (i32, i32, i32) {
    %c0_i32 = arith.constant 0 : i32
    %c0_i32_0 = arith.constant 0 : i32
    %c0_i32_1 = arith.constant 0 : i32
    return %arg1, %c0_i32, %c0_i32_0 : i32, i32, i32
  }
  func.func @transform_14(%arg0: i32, %arg1: i32) -> (i32, i32, i32) {
    %c0_i32 = arith.constant 0 : i32
    %c0_i32_0 = arith.constant 0 : i32
    %c0_i32_1 = arith.constant 0 : i32
    return %arg1, %c0_i32, %c0_i32_0 : i32, i32, i32
  }
  func.func @transform_15(%arg0: i32, %arg1: i32) -> (i32, i32) {
    %c0_i32 = arith.constant 0 : i32
    %c0_i32_0 = arith.constant 0 : i32
    %c0_i32_1 = arith.constant 0 : i32
    return %c0_i32, %c0_i32_0 : i32, i32
  }
  func.func @transform_16(%arg0: i32, %arg1: i32) -> (i32, i32) {
    %c0_i32 = arith.constant 0 : i32
    %c0_i32_0 = arith.constant 0 : i32
    %c0_i32_1 = arith.constant 0 : i32
    return %c0_i32, %c0_i32_0 : i32, i32
  }
  func.func @transform_17(%arg0: i32, %arg1: i32) -> (i32, i32, i32) {
    %c0_i32 = arith.constant 0 : i32
    %c0_i32_0 = arith.constant 0 : i32
    %c0_i32_1 = arith.constant 0 : i32
    return %arg0, %c0_i32, %c0_i32_0 : i32, i32, i32
  }
}

</mosaic_0001>

<bundles_post_ra>
// kernel: tpu_custom_call.1
= control target key start
LH: loop header
LB: loop body
LE: loop exit
PB: predicated region body
PF: predicated region fallthrough
CT: control target
= control target key end

     0   :  { %s4527_s0 = inlined_call_operand.vmem [shape: f32[2,8,64], index: 0, kind: input, shape index: {}]   ;;  %s4528_s1 = inlined_call_operand.vmem [shape: f32[1,64], index: 1, kind: input, shape index: {}]   ;;  %s4529_s2 = inlined_call_operand.vmem [shape: f32[1,64], index: 2, kind: input, shape index: {}]   ;;  %s4530_s3 = inlined_call_operand.vmem [shape: bf16[2,3,4,64,16], index: 3, kind: input, shape index: {}]   ;;  %s4531_s4 = inlined_call_operand.vmem [shape: f32[2,3,4,1,16], index: 4, kind: input, shape index: {}]   ;;  %s4532_s5 = inlined_call_operand.vmem [shape: bf16[2,4,16,64], index: 5, kind: input, shape index: {}]   ;;  %s4533_s6 = inlined_call_operand.vmem [shape: f32[2,1,64], index: 6, kind: input, shape index: {}]   ;;  %s4534_s7 = inlined_call_operand.vmem [shape: f32[2,1,64], index: 7, kind: input, shape index: {}]   ;;  %s4535_s8 = inlined_call_operand.vmem [shape: f32[2,1,64], index: 8, kind: input, shape index: {}]   ;;  %s4536_s9 = inlined_call_operand.vmem [shape: bf16[2,64,256], index: 9, kind: input, shape index: {}]   ;;  %s4537_s10 = inlined_call_operand.vmem [shape: f32[2,1,256], index: 10, kind: input, shape index: {}]   ;;  %s4538_s11 = inlined_call_operand.vmem [shape: bf16[2,256,64], index: 11, kind: input, shape index: {}]   ;;  %s4539_s12 = inlined_call_operand.vmem [shape: f32[2,1,64], index: 12, kind: input, shape index: {}]   ;;  %s4540_s13 = inlined_call_operand.vmem [shape: f32[2,1,64], index: 13, kind: input, shape index: {}]   ;;  %s4541_s14 = inlined_call_operand.vmem [shape: f32[2,1,64], index: 14, kind: input, shape index: {}]   ;;  %s4542_s15 = inlined_call_operand.vmem [shape: bf16[64,128], index: 15, kind: input, shape index: {}]   ;;  %s4543_s16 = inlined_call_operand.vmem [shape: f32[1,128], index: 16, kind: input, shape index: {}]   ;;  %s4544_s17 = inlined_call_operand.hbm [shape: f32[2,1,128], index: 17, kind: output, shape index: {}]  }
   0x1   :  { %4559 = sst [smem:[#allocation18_spill]] %s4527_s0 }
   0x2   :  { %4560 = sst [smem:[#allocation19_spill]] %s4528_s1 }
   0x3   :  { %4561 = sst [smem:[#allocation20_spill]] %s4529_s2 }
   0x4   :  { %4562 = sst [smem:[#allocation21_spill]] %s4530_s3 }
   0x5   :  { %4563 = sst [smem:[#allocation22_spill]] %s4531_s4 }
   0x6   :  { %4564 = sst [smem:[#allocation23_spill]] %s4532_s5 }
   0x7   :  { %4565 = sst [smem:[#allocation24_spill]] %s4536_s9 }
   0x8   :  { %4566 = sst [smem:[#allocation25_spill]] %s4537_s10 }
   0x9   :  { %4567 = sst [smem:[#allocation26_spill]] %s4541_s14 }
   0xa   :  { %4568 = sst [smem:[#allocation27_spill]] %s4542_s15 }
   0xb   :  { %4569 = sst [smem:[#allocation28_spill]] %s4543_s16 }
   0xc   :  { %4570 = sst [smem:[#allocation29_spill]] %s4544_s17 }
   0xd   :  { %22 = vsyncpa [#allocation4], 0 }
   0xe   :  { %24 = vsyncpa [#allocation4 + $0x1], 0  ;;  %s4000_s24 = smov 0   ;;  %s4002_s25 = smov 0  }
   0xf   :  { %s4004_s26 = smov 0   ;;  %s4006_s27 = smov 0  }
  0x10   :  { %s4008_s28 = smov 0   ;;  %s4010_s29 = smov 0  }
  0x11   :  { %s4012_s0 = smov 0   ;;  %s4014_s30 = smov 0  }
  0x12 LB: > { %4571 = sst [smem:[#allocation6_spill]] %s3874_s24  ;;  %s3060_s18 = sadd.s32 4294967295, %s3902_s30   ;;  %s3902_s30 = sphi %s4014_s30, %s30_s30   ;;  %s3898_s0 = sphi %s4012_s0, %s4616_s0   ;;  %s3894_s29 = sphi %s4010_s29, %s4615_s29   ;;  %s3890_s28 = sphi %s4008_s28, %s4614_s28   ;;  %s3886_s27 = sphi %s4006_s27, %s4613_s27   ;;  %s3882_s26 = sphi %s4004_s26, %s4612_s26   ;;  %s3878_s25 = sphi %s4002_s25, %s4618_s25   ;;  %s3874_s24 = sphi %s4000_s24, %s4617_s24  }
  0x13   : > { %4572 = sst [smem:[#allocation7_spill]] %s3882_s26  ;;  %s3061_s19 = sadd.s32 4294967294, %s3902_s30  }
  0x14   : > { %4573 = sst [smem:[#allocation8_spill]] %s3886_s27  ;;  %s39_s1 = sadd.s32 1, %s3894_s29 }
  0x15   : > { %4574 = sst [smem:[#allocation9_spill]] %s3890_s28  ;;  %p40_p0 = scmp.ge.s32.totalorder %s39_s1, 2 }
  0x16   : > { %4575 = sst [smem:[#allocation10_spill]] %s3894_s29  ;;  %s42_s20 = sadd.s32 1, %s3898_s0 }
  0x17   : > { %4576 = sst [smem:[#allocation11_spill]] %s3898_s0  ;;  %p481_p1 = scmp.ne.s32.totalorder %s3882_s26, %s3878_s25 }
  0x18   : > { %4577 = sst [smem:[#allocation12_spill]] %s3902_s30  ;;  %p482_p2 = scmp.eq.s32.totalorder %s3060_s18, 3 }
  0x19   : > { %s4620_s1 = smov (%p40_p0, %s39_s1), 0  ;;  %s4622_s20 = smov (!%p40_p0, %s42_s20), %s3898_s0 }
  0x1a   : > { %4578 = sst [smem:[#allocation13_spill]] %s4620_s1  ;;  %p4049_p3 = por %p482_p2, %p481_p1 }
  0x1b   : > { %p487_p4 = scmp.ne.s32.totalorder %s3878_s25, %s3874_s24  ;;  %p44_p5 = scmp.ge.s32.totalorder %s4622_s20, 2 }
  0x1c   : > { %s4579_s21 = scalar_select %p4049_p3, 1, 0 }
  0x1d   : > { %p488_p6 = scmp.eq.s32.totalorder %s3061_s19, 3  ;;  %p3064_p7 = scmp.ge.s32.totalorder %s3902_s30, 1 }
  0x1e   : > { %4580 = sst [smem:[#allocation14_spill]] %s4579_s21  ;;  %p607_p8 = scmp.lt.s32.totalorder %s3902_s30, 5 }
  0x1f   : > { %s4624_s20 = smov (%p44_p5, %s4622_s20), 0  ;;  %p4059_p9 = por %p488_p6, %p487_p4 }
  0x20   : > { %4581 = sst [smem:[#allocation15_spill]] %s4624_s20  ;;  %p608_p10 = pnand %p3064_p7, %p607_p8 }
  0x21   : > { %s4582_s22 = scalar_select %p4059_p9, 1, 0 }
  0x22   : > { %s468_s23 = ssub.s32 %s3898_s0, %s4624_s20  ;;  %s471_s18 = sadd.s32 1, %s3882_s26 }
  0x23   : > { %4583 = sst [smem:[#allocation16_spill]] %s4582_s22  ;;  %p469_p11 = scmp.eq.s32.totalorder %s468_s23, 0 }
  0x24   : > { %611 = sbr.rel (%p608_p10) target bundleno = 2535 (0x9e7), region = 88  ;;  %p703_p12 = scmp.lt.s32.totalorder (!%p608_p10), %s3890_s28, 1 }
  0x25   : > { %s4067_s1 = scalar_select %p469_p11, %s3882_s26, %s471_s18  }
  0x26   : > { %p707_p13 = scmp.lt.s32.totalorder (!%p608_p10), %s3886_s27, 1  ;;  %s4585_s0 = sld [smem:[#allocation18_spill]] (!%p608_p10) }
  0x27   : > { %4584 = sst [smem:[#allocation17_spill]] %s4067_s1  ;;  %s4586_s3 = sld [smem:[#allocation21_spill]] (!%p608_p10) }
  0x28   : > { %s4587_s5 = sld [smem:[#allocation23_spill]] (!%p608_p10)  ;;  %s4588_s4 = sld [smem:[#allocation22_spill]] (!%p608_p10) }
  0x29   : > { %s4589_s9 = sld [smem:[#allocation24_spill]] (!%p608_p10)  ;;  %s4590_s10 = sld [smem:[#allocation25_spill]] (!%p608_p10) }
  0x2b   : > { %s704_s29 = scalar_select %p703_p12, %s3890_s28, 1 }
  0x2c   : > { %s4074_s24 = scalar_select %p707_p13, %s3886_s27, 1 }
  0x2d   : > { %s3065_s23 = sshll.u32 %s704_s29, 3 }
  0x2e   : > { %s706_s19 = scalar_lea.vmem %s4585_s0, %s3065_s23  ;;  %s3619_s1 = smul.u32 384, %s4074_s24 }
  0x2f   : > { %s3620_s26 = smul.u32 12, %s4074_s24  ;;  %s3277_s22 = sshll.u32 %s4074_s24, 5 }
  0x30   : > { %s4085_s21 = scalar_lea.vmem %s4586_s3, %s3619_s1  ;;  %s4090_s29 = scalar_lea.vmem %s4587_s5, %s3277_s22 }
  0x31   : > { %s4095_s0 = scalar_lea.vmem %s4588_s4, %s3620_s26  ;;  %s3278_s16 = sshll.u32 %s4074_s24, 6 }
  0x32   : > { %s3071_s28 = sshll.u32 %s4074_s24, 1  ;;  %s4114_s15 = scalar_lea.vmem %s4589_s9, %s3278_s16 }
  0x33   : > { %s4119_s23 = scalar_lea.vmem %s4590_s10, %s3071_s28  ;;  %s3279_s18 = sshll.u32 %s4074_s24, 7 }
  0x34   : > { %s746_s27 = scalar_lea.vmem %s4539_s12, %s4074_s24  ;;  %s4129_s1 = scalar_lea.vmem %s4538_s11, %s3279_s18 }
  0x35   : > { %s749_s5 = scalar_lea.vmem %s4540_s13, %s4074_s24  ;;  %s4591_s9 = sld [smem:[#allocation26_spill]] }
  0x36   : > { %s4592_s28 = sand.u32 1, %s3878_s25   ;;  %s4593_s10 = sld [smem:[#allocation8_spill]] }
  0x37   : > { %s4141_s20 = scalar_lea.vmem [#allocation3], %s4592_s28 }
  0x3b   : > { %s752_s26 = scalar_lea.vmem %s4591_s9, %s4074_s24 }
  0x3c   : > { %p3074_p0 = scmp.ne.s32.totalorder %s4593_s10, 0 }
  0x3d   : > { %v758_v0 = vld [vmem:[%s706_s19] sm:$0xff] (!%p3074_p0)  ;;  %vm761_vm0 = vcmask (!%p3074_p0), 523264   ;;  %s4594_s4 = sld [smem:[#allocation19_spill]] (!%p3074_p0)  ;;  %s4595_s19 = sld [smem:[#allocation20_spill]] (!%p3074_p0) }
  0x3e   : > { %757 = sbr.rel (%p3074_p0) target bundleno = 233 (0xe9), region = 92  ;;  %v762_v1 = vsel (!%p3074_p0), %vm761_vm0, %v758_v0, 0.0  ;;  %v765_v2 = vmul.f32 (!%p3074_p0), %v758_v0, %v758_v0 }
  0x3f   : > { %763 = vadd.xlane.f32.xlu0 (!%p3074_p0), %v762_v1 }
  0x40   : > { %v766_v3 = vsel (!%p3074_p0), %vm761_vm0, %v765_v2, 0.0 }
  0x43   : > { %767 = vadd.xlane.f32.xlu0 (!%p3074_p0), %v766_v3  ;;  %v3075_v13 = vld [vmem:[%s4594_s4] ss:$0 sm:$0xff] (!%p3074_p0) }
  0x44   : > { %v3076_v15 = vld [vmem:[%s4595_s19] ss:$0 sm:$0xff] (!%p3074_p0) }
  0xcc   : > { %v764_v4 = vpop.xlane.xlu0 %763 }
  0xcd   : > { %v769_v5 = vmul.f32 0.015625, %v764_v4 }
  0xcf   : > { %v771_v7 = vmul.f32 %v769_v5, %v769_v5  ;;  %v773_v11 = vsub.f32 %v758_v0, %v769_v5 }
  0xd0   : > { %v768_v6 = vpop.xlane.xlu0 %767 }
  0xd1   : > { %v770_v8 = vmul.f32 0.015625, %v768_v6 }
  0xd3   : > { %v772_v9 = vsub.f32 %v770_v8, %v771_v7 }
  0xd5   : > { %v774_v10 = vadd.f32 1e-12, %v772_v9 }
  0xd7   : > { %3697 = vrsqrt.f32 %v774_v10 }
  0xe1   : > { %v3698_v12 = vpop.eup %3697 }
  0xe2   : > { %v776_v14 = vmul.f32 %v3698_v12, %v773_v11 }
  0xe4   : > { %v783_v16 = vmul.f32 %v3075_v13, %v776_v14 }
  0xe6   : > { %v790_v17 = vadd.f32 %v3076_v15, %v783_v16 }
  0xe8   : > { %791 = vst.msk [vmem:[#allocation2] sm:$0xff] %vm761_vm0, %v790_v17 }
  0xe9 PF: > { %v3699_v18 = vld [vmem:[%s4085_s21] sm:$0xff]   ;;  %v3904_v19 = vmov 0.0   ;;  %v3701_v21 = vld [vmem:[%s4085_s21 + $0x8] sm:$0xff]   ;;  %vm3905_vm1 = vmmov 0   ;;  %v3703_v23 = vld [vmem:[%s4085_s21 + $0x10] sm:$0xff]   ;;  %vm878_vm2 = vcmask 523264   ;;  %s4597_s18 = scalar_lea.vmem %s4534_s7, %s4074_s24  ;;  %s4598_s16 = scalar_lea.vmem %s4535_s8, %s4074_s24 }
  0xea   : > { %3391 = vmatprep.subr.bf16.mxu0 %v3904_v19  ;;  %3403 = vmatprep.subr.bf16.mxu1 %v3904_v19  ;;  %v3700_v20 = vld [vmem:[%s4085_s21 + $0x20] sm:$0xff]   ;;  %v3702_v22 = vld [vmem:[%s4085_s21 + $0x28] sm:$0xff]   ;;  %v3704_v24 = vld [vmem:[%s4085_s21 + $0x30] sm:$0xff]   ;;  %vm1758_vm3 = vcmask 130048   ;;  %vm2003_vm4 = vcmask 1043456   ;;  %vm1947_vm5 = vcmask 64512  }
  0xeb   : > { %3392 = vmatpush3.bf16.msra.mxu0 %v3699_v18  ;;  %3399 = vmatprep.mubr.msk.bf16.mxu0 %vm3905_vm1, %v3904_v19  ;;  %v3705_v25 = vld [vmem:[%s4085_s21 + $0x18] sm:$0xff]   ;;  %v3707_v29 = vld [vmem:[%s4085_s21 + $0x40] sm:$0xff]   ;;  %v3709_v31 = vld [vmem:[%s4085_s21 + $0x48] sm:$0xff]   ;;  %s4600_s4 = sld [smem:[#allocation8_spill]] }
  0xec   : > { %3404 = vmatpush3.bf16.msra.mxu1 %v3700_v20  ;;  %3393 = vmatprep.subr.bf16.mxu0 %v3904_v19  ;;  %v3706_v27 = vld [vmem:[%s4085_s21 + $0x38] sm:$0xff]   ;;  %v3708_v30 = vld [vmem:[%s4085_s21 + $0x60] sm:$0xff]   ;;  %v3710_v32 = vld [vmem:[%s4085_s21 + $0x68] sm:$0xff]  }
  0xed   : > { %3405 = vmatprep.subr.bf16.mxu1 %v3904_v19  ;;  %3411 = vmatprep.mubr.msk.bf16.mxu1 %vm3905_vm1, %v3904_v19  ;;  %v3711_v33 = vld [vmem:[%s4085_s21 + $0x50] sm:$0xff]   ;;  %v3713_v35 = vld [vmem:[%s4085_s21 + $0x58] sm:$0xff]   ;;  %v3715_v37 = vld [vmem:[%s4085_s21 + $0x80] sm:$0xff]  }
  0xee   : > { %v3712_v34 = vld [vmem:[%s4085_s21 + $0x70] sm:$0xff]   ;;  %v3714_v36 = vld [vmem:[%s4085_s21 + $0x78] sm:$0xff]   ;;  %v3716_v38 = vld [vmem:[%s4085_s21 + $0xa0] sm:$0xff]  }
  0xef   : > { %3394 = vmatpush3.bf16.msra.mxu0 %v3701_v21  ;;  %v792_v26 = vld [vmem:[#allocation2] sm:$0xff]  ;;  %v3717_v39 = vld [vmem:[%s4085_s21 + $0x88] sm:$0xff]   ;;  %v3719_v41 = vld [vmem:[%s4085_s21 + $0x90] sm:$0xff]  }
  0xf0   : > { %3406 = vmatpush3.bf16.msra.mxu1 %v3702_v22  ;;  %3395 = vmatprep.subr.bf16.mxu0 %v3904_v19  ;;  %v4173_v28 = vpack.c.bf16 %v792_v26, %v792_v26  ;;  %v3718_v40 = vld [vmem:[%s4085_s21 + $0xa8] sm:$0xff]   ;;  %v3720_v42 = vld [vmem:[%s4085_s21 + $0xb0] sm:$0xff]   ;;  %v3721_v43 = vld [vmem:[%s4085_s21 + $0x98] sm:$0xff]  }
  0xf1   : > { %3407 = vmatprep.subr.bf16.mxu1 %v3904_v19  ;;  %v3722_v44 = vld [vmem:[%s4085_s21 + $0xb8] sm:$0xff]   ;;  %v3723_v45 = vld [vmem:[%s4085_s21 + $0xc0] sm:$0xff]   ;;  %v3725_v47 = vld [vmem:[%s4085_s21 + $0xc8] sm:$0xff]   ;;  %p3268_p1 = scmp.ne.s32.totalorder %s4600_s4, 1 }
  0xf2   : > { %v3724_v46 = vld [vmem:[%s4085_s21 + $0xe0] sm:$0xff]   ;;  %v3726_v48 = vld [vmem:[%s4085_s21 + $0xe8] sm:$0xff]   ;;  %v3727_v49 = vld [vmem:[%s4085_s21 + $0xd0] sm:$0xff]   ;;  %s4601_s19 = sld [smem:[#allocation27_spill]] (!%p3268_p1)  ;;  %vm3908_vm6 = vmmov (!%p3268_p1), 0  }
  0xf3   : > { %3396 = vmatpush3.bf16.msra.mxu0 %v3703_v23  ;;  %v3728_v50 = vld [vmem:[%s4085_s21 + $0xf0] sm:$0xff]   ;;  %v3729_v51 = vld [vmem:[%s4085_s21 + $0xd8] sm:$0xff]   ;;  %v3731_v53 = vld [vmem:[%s4085_s21 + $0x100] sm:$0xff]  }
  0xf4   : > { %3408 = vmatpush3.bf16.msra.mxu1 %v3704_v24  ;;  %3397 = vmatprep.subr.bf16.mxu0 %v3904_v19  ;;  %v3730_v52 = vld [vmem:[%s4085_s21 + $0xf8] sm:$0xff]   ;;  %v3732_v54 = vld [vmem:[%s4085_s21 + $0x108] sm:$0xff]   ;;  %v3733_v55 = vld [vmem:[%s4085_s21 + $0x110] sm:$0xff]  }
  0xf5   : > { %3409 = vmatprep.subr.bf16.mxu1 %v3904_v19  ;;  %v3734_v56 = vld [vmem:[%s4085_s21 + $0x118] sm:$0xff]   ;;  %v3735_v57 = vld [vmem:[%s4085_s21 + $0x120] sm:$0xff]   ;;  %v3737_v59 = vld [vmem:[%s4085_s21 + $0x128] sm:$0xff]  }
  0xf6   : > { %v3736_v58 = vld [vmem:[%s4085_s21 + $0x140] sm:$0xff]   ;;  %v3738_v60 = vld [vmem:[%s4085_s21 + $0x148] sm:$0xff]   ;;  %v3739_v61 = vld [vmem:[%s4085_s21 + $0x130] sm:$0xff]  }
  0xf7   : > { %3398 = vmatpush3.bf16.msra.mxu0 %v3705_v25  ;;  %v3740_v62 = vld [vmem:[%s4085_s21 + $0x150] sm:$0xff]   ;;  %v3741_v63 = vld [vmem:[%s4085_s21 + $0x138] sm:$0xff]   ;;  %v3743_v1 = vld [vmem:[%s4085_s21 + $0x160] sm:$0xff]  }
  0xf8   : > { %3410 = vmatpush3.bf16.msra.mxu1 %v3706_v27  ;;  %3415 = vmatprep.subr.bf16.mxu0 %v3904_v19  ;;  %v3742_v0 = vld [vmem:[%s4085_s21 + $0x158] sm:$0xff]   ;;  %v3744_v2 = vld [vmem:[%s4085_s21 + $0x168] sm:$0xff]   ;;  %v3745_v3 = vld [vmem:[%s4085_s21 + $0x170] sm:$0xff]  }
  0xf9   : > { %3427 = vmatprep.subr.bf16.mxu1 %v3904_v19  ;;  %v3746_v4 = vld [vmem:[%s4085_s21 + $0x178] sm:$0xff]   ;;  %v3137_v22 = vld [vmem:[%s4095_s0 + $0x4] ss:$0 sm:$0xff] }
  0xfa   : > { %3400 = vmatmul.mubr.msk.bf16.vlgmr.msra.gmra.mrb[0].mxu0 %vm878_vm2, %v4173_v28 }
  0xfb   : > { %3412 = vmatmul.mubr.msk.bf16.vlgmr.msra.gmra.mrb[0].mxu1 %vm878_vm2, %v4173_v28  ;;  %3416 = vmatpush3.bf16.msra.mxu0 %v3707_v29 }
  0xfc   : > { %3428 = vmatpush3.bf16.msra.mxu1 %v3708_v30  ;;  %3417 = vmatprep.subr.bf16.mxu0 %v3904_v19 }
  0xfd   : > { %3429 = vmatprep.subr.bf16.mxu1 %v3904_v19  ;;  %3423 = vmatprep.mubr.msk.bf16.mxu0 %vm3905_vm1, %v3904_v19 }
  0xfe   : > { %3435 = vmatprep.mubr.msk.bf16.mxu1 %vm3905_vm1, %v3904_v19 }
  0xff   : > { %3418 = vmatpush3.bf16.msra.mxu0 %v3709_v31 }
 0x100   : > { %3430 = vmatpush3.bf16.msra.mxu1 %v3710_v32  ;;  %3419 = vmatprep.subr.bf16.mxu0 %v3904_v19 }
 0x101   : > { %3431 = vmatprep.subr.bf16.mxu1 %v3904_v19 }
 0x103   : > { %3420 = vmatpush3.bf16.msra.mxu0 %v3711_v33  ;;  %v3077_v33 = vld [vmem:[%s4095_s0] ss:$0 sm:$0xff] }
 0x104   : > { %3432 = vmatpush3.bf16.msra.mxu1 %v3712_v34  ;;  %3421 = vmatprep.subr.bf16.mxu0 %v3904_v19 }
 0x105   : > { %3433 = vmatprep.subr.bf16.mxu1 %v3904_v19 }
 0x107   : > { %3422 = vmatpush3.bf16.msra.mxu0 %v3713_v35 }
 0x108   : > { %3434 = vmatpush3.bf16.msra.mxu1 %v3714_v36  ;;  %3439 = vmatprep.subr.bf16.mxu0 %v3904_v19 }
 0x109   : > { %3451 = vmatprep.subr.bf16.mxu1 %v3904_v19 }
 0x10a   : > { %3424 = vmatmul.mubr.msk.bf16.vlgmr.msra.gmra.mrb[4].mxu0 %vm878_vm2, %v4173_v28 }
 0x10b   : > { %3436 = vmatmul.mubr.msk.bf16.vlgmr.msra.gmra.mrb[4].mxu1 %vm878_vm2, %v4173_v28  ;;  %3440 = vmatpush3.bf16.msra.mxu0 %v3715_v37 }
 0x10c   : > { %3452 = vmatpush3.bf16.msra.mxu1 %v3716_v38  ;;  %3441 = vmatprep.subr.bf16.mxu0 %v3904_v19 }
 0x10d   : > { %3453 = vmatprep.subr.bf16.mxu1 %v3904_v19  ;;  %3447 = vmatprep.mubr.msk.bf16.mxu0 %vm3905_vm1, %v3904_v19 }
 0x10e   : > { %3459 = vmatprep.mubr.msk.bf16.mxu1 %vm3905_vm1, %v3904_v19 }
 0x10f   : > { %3442 = vmatpush3.bf16.msra.mxu0 %v3717_v39 }
 0x110   : > { %3454 = vmatpush3.bf16.msra.mxu1 %v3718_v40  ;;  %3443 = vmatprep.subr.bf16.mxu0 %v3904_v19  ;;  %v3078_v40 = vld [vmem:[%s4095_s0 + $0x1] ss:$0 sm:$0xff] }
 0x111   : > { %3455 = vmatprep.subr.bf16.mxu1 %v3904_v19 }
 0x113   : > { %3444 = vmatpush3.bf16.msra.mxu0 %v3719_v41 }
 0x114   : > { %3456 = vmatpush3.bf16.msra.mxu1 %v3720_v42  ;;  %3445 = vmatprep.subr.bf16.mxu0 %v3904_v19  ;;  %v3139_v42 = vld [vmem:[%s4095_s0 + $0x6] ss:$0 sm:$0xff] }
 0x115   : > { %3457 = vmatprep.subr.bf16.mxu1 %v3904_v19 }
 0x117   : > { %3446 = vmatpush3.bf16.msra.mxu0 %v3721_v43 }
 0x118   : > { %3458 = vmatpush3.bf16.msra.mxu1 %v3722_v44  ;;  %3463 = vmatprep.subr.bf16.mxu0 %v3904_v19  ;;  %v3140_v44 = vld [vmem:[%s4095_s0 + $0x7] ss:$0 sm:$0xff] }
 0x119   : > { %3475 = vmatprep.subr.bf16.mxu1 %v3904_v19 }
 0x11a   : > { %3448 = vmatmul.mubr.msk.bf16.vlgmr.msra.gmra.mrb[8].mxu0 %vm878_vm2, %v4173_v28 }
 0x11b   : > { %3460 = vmatmul.mubr.msk.bf16.vlgmr.msra.gmra.mrb[8].mxu1 %vm878_vm2, %v4173_v28  ;;  %3464 = vmatpush3.bf16.msra.mxu0 %v3723_v45 }
 0x11c   : > { %3476 = vmatpush3.bf16.msra.mxu1 %v3724_v46  ;;  %3465 = vmatprep.subr.bf16.mxu0 %v3904_v19 }
 0x11d   : > { %3477 = vmatprep.subr.bf16.mxu1 %v3904_v19  ;;  %3471 = vmatprep.mubr.msk.bf16.mxu0 %vm3905_vm1, %v3904_v19 }
 0x11e   : > { %3483 = vmatprep.mubr.msk.bf16.mxu1 %vm3905_vm1, %v3904_v19 }
 0x11f   : > { %3466 = vmatpush3.bf16.msra.mxu0 %v3725_v47 }
 0x120   : > { %3478 = vmatpush3.bf16.msra.mxu1 %v3726_v48  ;;  %3467 = vmatprep.subr.bf16.mxu0 %v3904_v19 }
 0x121   : > { %3479 = vmatprep.subr.bf16.mxu1 %v3904_v19 }
 0x123   : > { %3468 = vmatpush3.bf16.msra.mxu0 %v3727_v49 }
 0x124   : > { %3480 = vmatpush3.bf16.msra.mxu1 %v3728_v50  ;;  %3469 = vmatprep.subr.bf16.mxu0 %v3904_v19 }
 0x125   : > { %3481 = vmatprep.subr.bf16.mxu1 %v3904_v19 }
 0x127   : > { %3470 = vmatpush3.bf16.msra.mxu0 %v3729_v51 }
 0x128   : > { %3482 = vmatpush3.bf16.msra.mxu1 %v3730_v52  ;;  %3487 = vmatprep.subr.bf16.mxu0 %v3904_v19 }
 0x129   : > { %3499 = vmatprep.subr.bf16.mxu1 %v3904_v19 }
 0x12a   : > { %3472 = vmatmul.mubr.msk.bf16.vlgmr.msra.gmra.mrb[12].mxu0 %vm878_vm2, %v4173_v28 }
 0x12b   : > { %3484 = vmatmul.mubr.msk.bf16.vlgmr.msra.gmra.mrb[12].mxu1 %vm878_vm2, %v4173_v28  ;;  %3488 = vmatpush3.bf16.msra.mxu0 %v3731_v53 }
 0x12c   : > { %3489 = vmatprep.subr.bf16.mxu0 %v3904_v19  ;;  %3495 = vmatprep.mubr.msk.bf16.mxu0 %vm3905_vm1, %v3904_v19 }
 0x12d   : > { %3507 = vmatprep.mubr.msk.bf16.mxu1 %vm3905_vm1, %v3904_v19  ;;  %3500 = vmatpush3.bf16.msra.mxu1 %v3735_v57 }
 0x12e   : > { %3501 = vmatprep.subr.bf16.mxu1 %v3904_v19 }
 0x12f   : > { %3490 = vmatpush3.bf16.msra.mxu0 %v3732_v54 }
 0x130   : > { %3491 = vmatprep.subr.bf16.mxu0 %v3904_v19 }
 0x131   : > { %3502 = vmatpush3.bf16.msra.mxu1 %v3737_v59  ;;  %v3080_v59 = vld [vmem:[%s4095_s0 + $0x3] ss:$0 sm:$0xff] }
 0x132   : > { %3503 = vmatprep.subr.bf16.mxu1 %v3904_v19 }
 0x133   : > { %3492 = vmatpush3.bf16.msra.mxu0 %v3733_v55 }
 0x134   : > { %3493 = vmatprep.subr.bf16.mxu0 %v3904_v19 }
 0x135   : > { %3504 = vmatpush3.bf16.msra.mxu1 %v3739_v61 }
 0x136   : > { %3505 = vmatprep.subr.bf16.mxu1 %v3904_v19 }
 0x137   : > { %3494 = vmatpush3.bf16.msra.mxu0 %v3734_v56  ;;  %v3079_v56 = vld [vmem:[%s4095_s0 + $0x2] ss:$0 sm:$0xff] }
 0x138   : > { %3511 = vmatprep.subr.bf16.mxu0 %v3904_v19 }
 0x139   : > { %3506 = vmatpush3.bf16.msra.mxu1 %v3741_v63 }
 0x13a   : > { %3496 = vmatmul.mubr.msk.bf16.vlgmr.msra.gmra.mrb[16].mxu0 %vm878_vm2, %v4173_v28  ;;  %3523 = vmatprep.subr.bf16.mxu1 %v3904_v19 }
 0x13b   : > { %3519 = vmatprep.mubr.msk.bf16.mxu0 %vm3905_vm1, %v3904_v19  ;;  %3512 = vmatpush3.bf16.msra.mxu0 %v3736_v58 }
 0x13c   : > { %3513 = vmatprep.subr.bf16.mxu0 %v3904_v19  ;;  %3508 = vmatmul.mubr.msk.bf16.vlgmr.msra.gmra.mrb[16].mxu1 %vm878_vm2, %v4173_v28 }
 0x13d   : > { %3524 = vmatpush3.bf16.msra.mxu1 %v3743_v1  ;;  %3531 = vmatprep.mubr.msk.bf16.mxu1 %vm3905_vm1, %v3904_v19 }
 0x13e   : > { %3525 = vmatprep.subr.bf16.mxu1 %v3904_v19 }
 0x13f   : > { %3514 = vmatpush3.bf16.msra.mxu0 %v3738_v60 }
 0x140   : > { %3515 = vmatprep.subr.bf16.mxu0 %v3904_v19 }
 0x141   : > { %3526 = vmatpush3.bf16.msra.mxu1 %v3744_v2  ;;  %v3197_v2 = vld [vmem:[%s4095_s0 + $0x8] ss:$0 sm:$0xff] }
 0x142   : > { %3527 = vmatprep.subr.bf16.mxu1 %v3904_v19 }
 0x143   : > { %3516 = vmatpush3.bf16.msra.mxu0 %v3740_v62 }
 0x144   : > { %3517 = vmatprep.subr.bf16.mxu0 %v3904_v19 }
 0x145   : > { %3528 = vmatpush3.bf16.msra.mxu1 %v3745_v3 }
 0x146   : > { %3529 = vmatprep.subr.bf16.mxu1 %v3904_v19 }
 0x147   : > { %3518 = vmatpush3.bf16.msra.mxu0 %v3742_v0 }
 0x148   : > { %3535 = vmatprep.subr.bf16.mxu0 %v3904_v19 }
 0x149   : > { %3530 = vmatpush3.bf16.msra.mxu1 %v3746_v4 }
 0x14a   : > { %3520 = vmatmul.mubr.msk.bf16.vlgmr.msra.gmra.mrb[20].mxu0 %vm878_vm2, %v4173_v28  ;;  %3553 = vmatprep.subr.bf16.mxu1 %v3904_v19 }
 0x14b   : > { %3537 = vmatprep.mubr.msk.bf16.mxu0 %vm3905_vm1, %v3904_v19 }
 0x14c   : > { %3532 = vmatmul.mubr.msk.bf16.vlgmr.msra.gmra.mrb[20].mxu1 %vm878_vm2, %v4173_v28  ;;  %v3138_v28 = vld [vmem:[%s4095_s0 + $0x5] ss:$0 sm:$0xff] }
 0x14d   : > { %3555 = vmatprep.mubr.msk.bf16.mxu1 %vm3905_vm1, %v3904_v19 }
 0x1cd   : > { %v916_v5 = vpop.f32.mrb[0].mxu0 }
 0x1ce   : > { %v3401_v6 = vpop.f32.mrb[1].mxu0  ;;  %v980_v7 = vpop.f32.mrb[0].mxu1  ;;  %v917_v37 = vadd.f32 %v3077_v33, %v916_v5 }
 0x1cf   : > { %v919_v8 = vpop.f32.mrb[2].mxu0  ;;  %v3413_v9 = vpop.f32.mrb[1].mxu1  ;;  %v981_v43 = vadd.f32 %v3078_v40, %v980_v7 }
 0x1d0   : > { %v3402_v10 = vpop.f32.mrb[3].mxu0  ;;  %v983_v11 = vpop.f32.mrb[2].mxu1  ;;  %v1750_v39 = vpack.c.bf16 %v917_v37, %v917_v37 }
 0x1d1   : > { %v3414_v12 = vpop.f32.mrb[3].mxu1  ;;  %v1751_v52 = vpack.c.bf16 %v981_v43, %v981_v43  ;;  %v3198_v10 = vld [vmem:[%s4095_s0 + $0x9] ss:$0 sm:$0xff]  ;;  %v3199_v11 = vld [vmem:[%s4095_s0 + $0xa] ss:$0 sm:$0xff] }
 0x1dd   : > { %v1044_v13 = vpop.f32.mrb[4].mxu0 }
 0x1de   : > { %v3425_v14 = vpop.f32.mrb[5].mxu0  ;;  %v1108_v15 = vpop.f32.mrb[4].mxu1  ;;  %v1045_v62 = vadd.f32 %v3079_v56, %v1044_v13 }
 0x1df   : > { %v1047_v16 = vpop.f32.mrb[6].mxu0  ;;  %v3437_v17 = vpop.f32.mrb[5].mxu1  ;;  %v1109_v63 = vadd.f32 %v3080_v59, %v1108_v15 }
 0x1e0   : > { %v3426_v18 = vpop.f32.mrb[7].mxu0  ;;  %v1111_v20 = vpop.f32.mrb[6].mxu1  ;;  %v1752_v0 = vpack.c.bf16 %v1045_v62, %v1045_v62 }
 0x1e1   : > { %v3438_v21 = vpop.f32.mrb[7].mxu1  ;;  %v1753_v1 = vpack.c.bf16 %v1109_v63, %v1109_v63 }
 0x1ed   : > { %v1234_v23 = vpop.f32.mrb[8].mxu0 }
 0x1ee   : > { %v1235_v24 = vadd.f32 %v3137_v22, %v1234_v23  ;;  %v3449_v25 = vpop.f32.mrb[9].mxu0  ;;  %v1298_v26 = vpop.f32.mrb[8].mxu1 }
 0x1ef   : > { %v1237_v27 = vpop.f32.mrb[10].mxu0  ;;  %v3461_v29 = vpop.f32.mrb[9].mxu1  ;;  %v1299_v36 = vadd.f32 %v3138_v28, %v1298_v26 }
 0x1f0   : > { %v1754_v30 = vpack.c.bf16 %v1235_v24, %v1235_v24  ;;  %v3450_v31 = vpop.f32.mrb[11].mxu0  ;;  %v1301_v32 = vpop.f32.mrb[10].mxu1  ;;  %v3200_v27 = vld [vmem:[%s4095_s0 + $0xb] ss:$0 sm:$0xff]  ;;  %s4596_s0 = scalar_lea.vmem %s4533_s6, %s4074_s24 }
 0x1f1   : > { %v3462_v34 = vpop.f32.mrb[11].mxu1  ;;  %v1755_v38 = vpack.c.bf16 %v1299_v36, %v1299_v36 }
 0x1f2   : > { %v1763_v35 = vsel %vm1758_vm3, %v1754_v30, 0 }
 0x1f3   : > { %3536 = vmatpush3.bf16.xpose.msra.mxu0 %v1763_v35  ;;  %v1809_v41 = vsel %vm1758_vm3, %v1755_v38, 0 }
 0x1f4   : > { %3541 = vmatprep.subr.bf16.mxu0 %v3904_v19 }
 0x1fa   : > { %3538 = vmatmul.mubr.msk.bf16.vlgmr.msra.gmra.mrb[24].mxu0 %vm1758_vm3, %v1750_v39 }
 0x1fb   : > { %3542 = vmatpush3.bf16.xpose.msra.mxu0 %v1809_v41  ;;  %3543 = vmatprep.mubr.msk.bf16.mxu0 %vm3905_vm1, %v3904_v19 }
 0x1fc   : > { %3547 = vmatprep.subr.bf16.mxu0 %v3904_v19 }
 0x1fd   : > { %v1362_v45 = vpop.f32.mrb[12].mxu0 }
 0x1fe   : > { %v1363_v46 = vadd.f32 %v3139_v42, %v1362_v45  ;;  %v1426_v47 = vpop.f32.mrb[12].mxu1  ;;  %v3473_v48 = vpop.f32.mrb[13].mxu0 }
 0x1ff   : > { %v1427_v49 = vadd.f32 %v3140_v44, %v1426_v47  ;;  %v1365_v50 = vpop.f32.mrb[14].mxu0  ;;  %v3485_v51 = vpop.f32.mrb[13].mxu1 }
 0x200   : > { %v1756_v53 = vpack.c.bf16 %v1363_v46, %v1363_v46  ;;  %v3474_v54 = vpop.f32.mrb[15].mxu0  ;;  %v1429_v55 = vpop.f32.mrb[14].mxu1 }
 0x201   : > { %v1757_v57 = vpack.c.bf16 %v1427_v49, %v1427_v49  ;;  %v3486_v58 = vpop.f32.mrb[15].mxu1 }
 0x202   : > { %v1855_v60 = vsel %vm1758_vm3, %v1756_v53, 0  ;;  %3544 = vmatmul.mubr.msk.bf16.vlgmr.msra.gmra.mrb[28].mxu0 %vm1758_vm3, %v1751_v52 }
 0x203   : > { %v1901_v61 = vsel %vm1758_vm3, %v1757_v57, 0  ;;  %3548 = vmatpush3.bf16.xpose.msra.mxu0 %v1855_v60  ;;  %3549 = vmatprep.mubr.msk.bf16.mxu0 %vm3905_vm1, %v3904_v19 }
 0x204   : > { %3554 = vmatpush3.bf16.xpose.msra.mxu1 %v1901_v61  ;;  %3559 = vmatprep.subr.bf16.mxu0 %v3904_v19 }
 0x205   : > { %3565 = vmatprep.subr.bf16.mxu1 %v3904_v19 }
 0x20a   : > { %3550 = vmatmul.mubr.msk.bf16.vlgmr.msra.gmra.mrb[32].mxu0 %vm1758_vm3, %v1752_v0 }
 0x20b   : > { %3556 = vmatmul.mubr.msk.bf16.vlgmr.msra.gmra.mrb[24].mxu1 %vm1758_vm3, %v1753_v1  ;;  %3561 = vmatprep.mubr.msk.bf16.mxu0 %vm3905_vm1, %v3904_v19 }
 0x20c   : > { %3567 = vmatprep.mubr.msk.bf16.mxu1 %vm3905_vm1, %v3904_v19 }
 0x20d   : > { %v1552_v3 = vpop.f32.mrb[16].mxu0 }
 0x20e   : > { %v1553_v4 = vadd.f32 %v3197_v2, %v1552_v3  ;;  %v3497_v5 = vpop.f32.mrb[17].mxu0 }
 0x20f   : > { %v1555_v6 = vpop.f32.mrb[18].mxu0  ;;  %v1616_v12 = vpop.f32.mrb[16].mxu1 }
 0x210   : > { %v1996_v7 = vpack.c.bf16 %v1553_v4, %v1553_v4  ;;  %v3498_v8 = vpop.f32.mrb[19].mxu0  ;;  %v1617_v14 = vadd.f32 %v3198_v10, %v1616_v12  ;;  %v3509_v15 = vpop.f32.mrb[17].mxu1 }
 0x211   : > { %v1619_v18 = vpop.f32.mrb[18].mxu1 }
 0x212   : > { %v2005_v9 = vsel %vm2003_vm4, %v1996_v7, 0  ;;  %v1997_v21 = vpack.c.bf16 %v1617_v14, %v1617_v14  ;;  %v3510_v23 = vpop.f32.mrb[19].mxu1 }
 0x213   : > { %3560 = vmatpush3.bf16.msra.mxu0 %v2005_v9 }
 0x214   : > { %3571 = vmatprep.subr.bf16.mxu0 %v3904_v19  ;;  %v2051_v25 = vsel %vm2003_vm4, %v1997_v21, 0 }
 0x215   : > { %3566 = vmatpush3.bf16.msra.mxu1 %v2051_v25 }
 0x216   : > { %3577 = vmatprep.subr.bf16.mxu1 %v3904_v19 }
 0x21d   : > { %v1680_v13 = vpop.f32.mrb[20].mxu0 }
 0x21e   : > { %v1681_v16 = vadd.f32 %v3199_v11, %v1680_v13  ;;  %v3521_v17 = vpop.f32.mrb[21].mxu0 }
 0x21f   : > { %v1683_v20 = vpop.f32.mrb[22].mxu0  ;;  %v1744_v28 = vpop.f32.mrb[20].mxu1 }
 0x220   : > { %v1998_v22 = vpack.c.bf16 %v1681_v16, %v1681_v16  ;;  %v3522_v24 = vpop.f32.mrb[23].mxu0  ;;  %v1745_v29 = vadd.f32 %v3200_v27, %v1744_v28  ;;  %v3533_v30 = vpop.f32.mrb[21].mxu1 }
 0x221   : > { %v1747_v31 = vpop.f32.mrb[22].mxu1 }
 0x222   : > { %v4340_v26 = vsel %vm2003_vm4, %v1998_v22, 0  ;;  %v1999_v32 = vpack.c.bf16 %v1745_v29, %v1745_v29  ;;  %v3534_v33 = vpop.f32.mrb[23].mxu1 }
 0x223   : > { %v3748_v33 = vld [vmem:[%s4090_s29 + $0x8] sm:$0xff]  }
 0x224   : > { %v4345_v34 = vsel %vm2003_vm4, %v1999_v32, 0  ;;  %v3747_v32 = vld [vmem:[%s4090_s29] sm:$0xff]  }
 0x2cd   : > { %v1799_v35 = vpop.f32.mrb[24].mxu0 }
 0x2ce   : > { %v1943_v36 = vmul.f32 0.25, %v1799_v35  ;;  %v3539_v37 = vpop.f32.mrb[25].mxu0  ;;  %v3749_v35 = vld [vmem:[%s4090_s29 + $0x10] sm:$0xff]  }
 0x2cf   : > { %v1802_v38 = vpop.f32.mrb[26].mxu0 }
 0x2d0   : > { %v3540_v39 = vpop.f32.mrb[27].mxu0  ;;  %v1948_v40 = vsel %vm1947_vm5, %v1943_v36, -inf }
 0x2d1   : > { %1949 = vmax.xlane.f32.xlu0 %v1948_v40 }
 0x2d5   : > { %v1845_v41 = vpop.f32.mrb[28].mxu0 }
 0x2d6   : > { %v1944_v42 = vmul.f32 0.25, %v1845_v41  ;;  %v3545_v43 = vpop.f32.mrb[29].mxu0  ;;  %v3750_v41 = vld [vmem:[%s4090_s29 + $0x18] sm:$0xff]  }
 0x2d7   : > { %v1848_v44 = vpop.f32.mrb[30].mxu0 }
 0x2d8   : > { %v3546_v45 = vpop.f32.mrb[31].mxu0  ;;  %v1951_v46 = vsel %vm1947_vm5, %v1944_v42, -inf }
 0x2d9   : > { %1952 = vmax.xlane.f32.xlu0 %v1951_v46 }
 0x2dd   : > { %v1891_v47 = vpop.f32.mrb[32].mxu0 }
 0x2de   : > { %v1945_v48 = vmul.f32 0.25, %v1891_v47  ;;  %v1937_v49 = vpop.f32.mrb[24].mxu1  ;;  %v3551_v50 = vpop.f32.mrb[33].mxu0 }
 0x2df   : > { %v3557_v51 = vpop.f32.mrb[25].mxu1  ;;  %v1894_v52 = vpop.f32.mrb[34].mxu0  ;;  %v1946_v53 = vmul.f32 0.25, %v1937_v49 }
 0x2e0   : > { %v1940_v54 = vpop.f32.mrb[26].mxu1  ;;  %v3552_v55 = vpop.f32.mrb[35].mxu0  ;;  %v1954_v56 = vsel %vm1947_vm5, %v1945_v48, -inf }
 0x2e1   : > { %v3558_v57 = vpop.f32.mrb[27].mxu1  ;;  %1955 = vmax.xlane.f32.xlu1 %v1954_v56  ;;  %v1957_v58 = vsel %vm1947_vm5, %v1946_v53, -inf }
 0x2e5   : > { %1958 = vmax.xlane.f32.xlu1 %v1957_v58 }
 0x35e   : > { %v1950_v59 = vpop.xlane.xlu0 %1949 }
 0x35f   : > { %v1960_v60 = vsub.f32 %v1943_v36, %v1950_v59 }
 0x361   : > { %v1964_v61 = vmul.f32 1.442695, %v1960_v60 }
 0x363   : > { %3779 = vpow2.f32 %v1964_v61 }
 0x366   : > { %v1953_v62 = vpop.xlane.xlu0 %1952 }
 0x367   : > { %v1961_v63 = vsub.f32 %v1944_v42, %v1953_v62 }
 0x369   : > { %v1966_v0 = vmul.f32 1.442695, %v1961_v63 }
 0x36b   : > { %3781 = vpow2.f32 %v1966_v0 }
 0x36d   : > { %v3780_v1 = vpop.eup %3779 }
 0x36e   : > { %v1956_v2 = vpop.xlane.xlu1 %1955  ;;  %v1972_v3 = vsel %vm1947_vm5, %v3780_v1, 0.0 }
 0x36f   : > { %v1962_v4 = vsub.f32 %v1945_v48, %v1956_v2  ;;  %1973 = vadd.xlane.f32.xlu0 %v1972_v3 }
 0x371   : > { %v1968_v5 = vmul.f32 1.442695, %v1962_v4 }
 0x372   : > { %v1959_v6 = vpop.xlane.xlu1 %1958 }
 0x373   : > { %3783 = vpow2.f32 %v1968_v5  ;;  %v1963_v7 = vsub.f32 %v1946_v53, %v1959_v6 }
 0x375   : > { %v3782_v8 = vpop.eup %3781  ;;  %v1970_v9 = vmul.f32 1.442695, %v1963_v7 }
 0x376   : > { %v1975_v10 = vsel %vm1947_vm5, %v3782_v8, 0.0 }
 0x377   : > { %3785 = vpow2.f32 %v1970_v9  ;;  %1976 = vadd.xlane.f32.xlu1 %v1975_v10  ;;  %v3237_v10 = vld [vmem:[%s4596_s0] ss:$0 sm:$0xff] }
 0x37d   : > { %v3784_v11 = vpop.eup %3783 }
 0x37e   : > { %v1978_v12 = vsel %vm1947_vm5, %v3784_v11, 0.0 }
 0x37f   : > { %1979 = vadd.xlane.f32.xlu0 %v1978_v12 }
 0x381   : > { %v3786_v13 = vpop.eup %3785 }
 0x382   : > { %v1981_v14 = vsel %vm1947_vm5, %v3786_v13, 0.0 }
 0x383   : > { %1982 = vadd.xlane.f32.xlu1 %v1981_v14 }
 0x3fc   : > { %v1974_v15 = vpop.xlane.xlu0 %1973 }
 0x3fd   : > { %3787 = vrcp.f32 %v1974_v15 }
 0x404   : > { %v1977_v16 = vpop.xlane.xlu1 %1976 }
 0x405   : > { %3789 = vrcp.f32 %v1977_v16  ;;  %v3803_v16 = vld [vmem:[#allocation2] sm:$0xff] }
 0x407   : > { %v3788_v17 = vpop.eup %3787 }
 0x408   : > { %v1988_v18 = vmul.f32 %v3788_v17, %v3780_v1 }
 0x40a   : > { %v1992_v20 = vpack.c.bf16 %v1988_v18, %v1988_v18 }
 0x40c   : > { %3562 = vmatmul.mubr.msk.bf16.vlgmr.msra.gmra.mrb[36].mxu0 %vm1947_vm5, %v1992_v20  ;;  %v1980_v21 = vpop.xlane.xlu0 %1979 }
 0x40d   : > { %3572 = vmatpush3.bf16.msra.mxu0 %v4340_v26  ;;  %3791 = vrcp.f32 %v1980_v21  ;;  %3573 = vmatprep.mubr.msk.bf16.mxu0 %vm3905_vm1, %v3904_v19 }
 0x40e   : > { %3583 = vmatprep.subr.bf16.mxu0 %v3904_v19 }
 0x40f   : > { %v3790_v22 = vpop.eup %3789 }
 0x410   : > { %v1989_v23 = vmul.f32 %v3790_v22, %v3782_v8  ;;  %v1983_v24 = vpop.xlane.xlu1 %1982  ;;  %v3753_v22 = vld [vmem:[%s4114_s15 + $0x4] ss:$8 sps:$4 sm:$0xff]  }
 0x411   : > { %3793 = vrcp.f32 %v1983_v24  ;;  %v3756_v24 = vld [vmem:[%s4114_s15 + $0x14] ss:$8 sps:$4 sm:$0xff]  }
 0x412   : > { %v1993_v25 = vpack.c.bf16 %v1989_v23, %v1989_v23  ;;  %v3751_v23 = vld [vmem:[%s4114_s15] ss:$8 sps:$4 sm:$0xff]  }
 0x414   : > { %3568 = vmatmul.mubr.msk.bf16.vlgmr.msra.gmra.mrb[28].mxu1 %vm1947_vm5, %v1993_v25  ;;  %v3754_v25 = vld [vmem:[%s4114_s15 + $0x10] ss:$8 sps:$4 sm:$0xff]  }
 0x415   : > { %3578 = vmatpush3.bf16.msra.mxu1 %v4345_v34  ;;  %3579 = vmatprep.mubr.msk.bf16.mxu1 %vm3905_vm1, %v3904_v19 }
 0x416   : > { %3589 = vmatprep.subr.bf16.mxu1 %v3904_v19 }
 0x417   : > { %v3792_v26 = vpop.eup %3791 }
 0x418   : > { %v1990_v27 = vmul.f32 %v3792_v26, %v3784_v11  ;;  %v3759_v26 = vld [vmem:[%s4114_s15 + $0x24] ss:$8 sps:$4 sm:$0xff]  }
 0x41a   : > { %v1994_v28 = vpack.c.bf16 %v1990_v27, %v1990_v27  ;;  %v3757_v27 = vld [vmem:[%s4114_s15 + $0x20] ss:$8 sps:$4 sm:$0xff]  }
 0x41b   : > { %v3794_v29 = vpop.eup %3793 }
 0x41c   : > { %v1991_v30 = vmul.f32 %v3794_v29, %v3786_v13  ;;  %3574 = vmatmul.mubr.msk.bf16.vlgmr.msra.gmra.mrb[40].mxu0 %vm1947_vm5, %v1994_v28  ;;  %v3762_v28 = vld [vmem:[%s4114_s15 + $0x34] ss:$8 sps:$4 sm:$0xff]   ;;  %v3760_v29 = vld [vmem:[%s4114_s15 + $0x30] ss:$8 sps:$4 sm:$0xff]  }
 0x41d   : > { %3585 = vmatprep.mubr.msk.bf16.mxu0 %vm3905_vm1, %v3904_v19  ;;  %3584 = vmatpush3.bf16.msra.mxu0 %v3747_v32 }
 0x41e   : > { %v1995_v31 = vpack.c.bf16 %v1991_v30, %v1991_v30  ;;  %3595 = vmatprep.subr.bf16.mxu0 %v3904_v19  ;;  %v3906_v30 = vmov 0  }
 0x420   : > { %3580 = vmatmul.mubr.msk.bf16.vlgmr.msra.gmra.mrb[32].mxu1 %vm1947_vm5, %v1995_v31 }
 0x421   : > { %3591 = vmatprep.mubr.msk.bf16.mxu1 %vm3905_vm1, %v3904_v19  ;;  %3590 = vmatpush3.bf16.msra.mxu1 %v3748_v33 }
 0x422   : > { %3601 = vmatprep.subr.bf16.mxu1 %v3904_v19 }
 0x4df   : > { %v2041_v34 = vpop.f32.mrb[36].mxu0 }
 0x4e0   : > { %v2185_v36 = vpack.c.bf16 %v2041_v34, %v2041_v34  ;;  %v3563_v37 = vpop.f32.mrb[37].mxu0 }
 0x4e1   : > { %v2044_v38 = vpop.f32.mrb[38].mxu0 }
 0x4e2   : > { %v3564_v39 = vpop.f32.mrb[39].mxu0  ;;  %3586 = vmatmul.mubr.msk.bf16.vlgmr.msra.gmra.mrb[44].mxu0 %vm1758_vm3, %v2185_v36 }
 0x4e3   : > { %3596 = vmatpush3.bf16.msra.mxu0 %v3749_v35  ;;  %3597 = vmatprep.mubr.msk.bf16.mxu0 %vm3905_vm1, %v3904_v19 }
 0x4e4   : > { %2504 = vmatprep.subr.bf16.mxu0 %v3753_v22 }
 0x4e7   : > { %v2087_v40 = vpop.f32.mrb[28].mxu1 }
 0x4e8   : > { %v2186_v42 = vpack.c.bf16 %v2087_v40, %v2087_v40  ;;  %v3569_v43 = vpop.f32.mrb[29].mxu1  ;;  %v3238_v40 = vld [vmem:[%s4597_s18] ss:$0 sm:$0xff]  ;;  %s4602_s18 = sld [smem:[#allocation28_spill]] (!%p3268_p1) }
 0x4e9   : > { %v2090_v44 = vpop.f32.mrb[30].mxu1 }
 0x4ea   : > { %v3570_v45 = vpop.f32.mrb[31].mxu1  ;;  %3592 = vmatmul.mubr.msk.bf16.vlgmr.msra.gmra.mrb[36].mxu1 %vm1758_vm3, %v2186_v42  ;;  %v3239_v42 = vld [vmem:[%s4598_s16] ss:$0 sm:$0xff] }
 0x4eb   : > { %3602 = vmatpush3.bf16.msra.mxu1 %v3750_v41  ;;  %3603 = vmatprep.mubr.msk.bf16.mxu1 %vm3905_vm1, %v3904_v19 }
 0x4ef   : > { %v2133_v46 = vpop.f32.mrb[40].mxu0 }
 0x4f0   : > { %v2187_v47 = vpack.c.bf16 %v2133_v46, %v2133_v46  ;;  %v3575_v48 = vpop.f32.mrb[41].mxu0  ;;  %v3763_v46 = vld [vmem:[%s4129_s1 + $0x40] sm:$0xff]  }
 0x4f1   : > { %v2136_v49 = vpop.f32.mrb[42].mxu0  ;;  %3364 = vmatprep.subr.bf16.mxu1 %v3763_v46  ;;  %v3765_v48 = vld [vmem:[%s4129_s1 + $0x48] sm:$0xff]  }
 0x4f2   : > { %v3576_v50 = vpop.f32.mrb[43].mxu0  ;;  %3598 = vmatmul.mubr.msk.bf16.vlgmr.msra.gmra.mrb[48].mxu0 %vm1758_vm3, %v2187_v47  ;;  %v3764_v47 = vld [vmem:[%s4129_s1] sm:$0xff]   ;;  %v3766_v49 = vld [vmem:[%s4129_s1 + $0x8] sm:$0xff]  }
 0x4f3   : > { %v2179_v51 = vpop.f32.mrb[32].mxu1  ;;  %2505 = vmatpush1.bf16.msra.mxu0 %v3751_v23  ;;  %2536 = vmatprep.mubr.bf16.mxu0 %v3906_v30  ;;  %v3767_v50 = vld [vmem:[%s4129_s1 + $0x50] sm:$0xff]  }
 0x4f4   : > { %v2188_v52 = vpack.c.bf16 %v2179_v51, %v2179_v51  ;;  %v3581_v53 = vpop.f32.mrb[33].mxu1  ;;  %2506 = vmatprep.subr.bf16.mxu0 %v3756_v24  ;;  %v3768_v51 = vld [vmem:[%s4129_s1 + $0x10] sm:$0xff]  }
 0x4f5   : > { %v2182_v54 = vpop.f32.mrb[34].mxu1  ;;  %v3770_v53 = vld [vmem:[%s4129_s1 + $0x18] sm:$0xff]  }
 0x4f6   : > { %v3582_v55 = vpop.f32.mrb[35].mxu1  ;;  %3604 = vmatmul.mubr.msk.bf16.vlgmr.msra.gmra.mrb[40].mxu1 %vm1758_vm3, %v2188_v52  ;;  %v3769_v52 = vld [vmem:[%s4129_s1 + $0x58] sm:$0xff]   ;;  %v3771_v54 = vld [vmem:[%s4129_s1 + $0x60] sm:$0xff]  }
 0x4f7   : > { %2507 = vmatpush1.bf16.msra.mxu0 %v3754_v25  ;;  %3365 = vmatpush3.bf16.msra.mxu1 %v3764_v47  ;;  %v3772_v55 = vld [vmem:[%s4129_s1 + $0x20] sm:$0xff]  }
 0x4f8   : > { %2508 = vmatprep.subr.bf16.mxu0 %v3759_v26  ;;  %3366 = vmatprep.subr.bf16.mxu1 %v3765_v48 }
 0x4fb   : > { %2509 = vmatpush1.bf16.msra.mxu0 %v3757_v27  ;;  %3367 = vmatpush3.bf16.msra.mxu1 %v3766_v49 }
 0x4fc   : > { %2510 = vmatprep.subr.bf16.mxu0 %v3762_v28  ;;  %3368 = vmatprep.subr.bf16.mxu1 %v3767_v50 }
 0x4ff   : > { %2511 = vmatpush1.bf16.msra.mxu0 %v3760_v29  ;;  %3369 = vmatpush3.bf16.msra.mxu1 %v3768_v51 }
 0x500   : > { %3370 = vmatprep.subr.bf16.mxu1 %v3769_v52 }
 0x503   : > { %3371 = vmatpush3.bf16.msra.mxu1 %v3770_v53  ;;  %v3267_v53 = vld [vmem:[%s752_s26] ss:$0 sm:$0xff] }
 0x504   : > { %3372 = vmatprep.subr.bf16.mxu1 %v3771_v54 }
 0x507   : > { %3373 = vmatpush3.bf16.msra.mxu1 %v3772_v55 }
 0x5b5   : > { %v2240_v56 = vpop.f32.mrb[44].mxu0 }
 0x5b6   : > { %v3587_v57 = vpop.f32.mrb[45].mxu0  ;;  %v2393_v60 = vsel %vm878_vm2, %v2240_v56, 0.0  ;;  %v3773_v56 = vld [vmem:[%s4129_s1 + $0x68] sm:$0xff]  }
 0x5b7   : > { %v2243_v58 = vpop.f32.mrb[46].mxu0  ;;  %v3774_v57 = vld [vmem:[%s4129_s1 + $0x28] sm:$0xff]   ;;  %3374 = vmatprep.subr.bf16.mxu1 %v3773_v56  ;;  %v3804_v56 = vld [vmem:[%s4601_s19] sm:$0xff] (!%p3268_p1)  }
 0x5b8   : > { %v3588_v59 = vpop.f32.mrb[47].mxu0  ;;  %v3775_v58 = vld [vmem:[%s4129_s1 + $0x70] sm:$0xff]   ;;  %3375 = vmatpush3.bf16.msra.mxu1 %v3774_v57  ;;  %v3907_v57 = vmov (!%p3268_p1), 0.0  }
 0x5b9   : > { %v3776_v59 = vld [vmem:[%s4129_s1 + $0x30] sm:$0xff]   ;;  %3376 = vmatprep.subr.bf16.mxu1 %v3775_v58  ;;  %3607 = vmatprep.subr.bf16.mxu0 (!%p3268_p1), %v3907_v57  ;;  %v3805_v58 = vld [vmem:[%s4601_s19 + $0x8] sm:$0xff] (!%p3268_p1)  }
 0x5bc   : > { %3377 = vmatpush3.bf16.msra.mxu1 %v3776_v59  ;;  %v3806_v59 = vld [vmem:[%s4601_s19 + $0x10] sm:$0xff] (!%p3268_p1)  }
 0x5bd   : > { %v2289_v19 = vpop.f32.mrb[36].mxu1 }
 0x5be   : > { %v2394_v61 = vsel %vm878_vm2, %v2289_v19, 0.0  ;;  %v3593_v62 = vpop.f32.mrb[37].mxu1  ;;  %v3777_v19 = vld [vmem:[%s4129_s1 + $0x78] sm:$0xff]  }
 0x5bf   : > { %v2395_v63 = vadd.f32 %v2394_v61, %v2393_v60  ;;  %v2292_v0 = vpop.f32.mrb[38].mxu1  ;;  %v3778_v60 = vld [vmem:[%s4129_s1 + $0x38] sm:$0xff]   ;;  %3378 = vmatprep.subr.bf16.mxu1 %v3777_v19  ;;  %v2451_v61 = vlaneseq }
 0x5c0   : > { %v3594_v1 = vpop.f32.mrb[39].mxu1  ;;  %3379 = vmatpush3.bf16.msra.mxu1 %v3778_v60  ;;  %v2449_v0 = vld [vmem:[%s4119_s23] sm:$0x3]  ;;  %v3807_v19 = vld [vmem:[%s4601_s19 + $0x18] sm:$0xff] (!%p3268_p1)  }
 0x5c1   : > { %v2452_v62 = vshrl.u32 %v2451_v61, 7  ;;  %v2786_v61 = vld [vmem:[%s4602_s18] sm:$0x1] (!%p3268_p1) }
 0x5c3   : > { %v2457_v1 = vsub.s32 1, %v2452_v62 }
 0x5c5   : > { %v2338_v2 = vpop.f32.mrb[48].mxu0 }
 0x5c6   : > { %v2396_v3 = vsel %vm878_vm2, %v2338_v2, 0.0  ;;  %v3599_v4 = vpop.f32.mrb[49].mxu0 }
 0x5c7   : > { %v2397_v5 = vadd.f32 %v2396_v3, %v2395_v63  ;;  %v2341_v6 = vpop.f32.mrb[50].mxu0  ;;  %v2453_v63 = vsub.s32 0, %v2452_v62  ;;  %v2458_v3 = vrot.slane %v2449_v0, %v2457_v1 }
 0x5c8   : > { %v3600_v7 = vpop.f32.mrb[51].mxu0 }
 0x5c9   : > { %v2387_v8 = vpop.f32.mrb[40].mxu1  ;;  %v2454_v2 = vrot.slane %v2449_v0, %v2453_v63 }
 0x5ca   : > { %v2398_v9 = vsel %vm878_vm2, %v2387_v8, 0.0  ;;  %v3605_v11 = vpop.f32.mrb[41].mxu1 }
 0x5cb   : > { %v2399_v12 = vadd.f32 %v2398_v9, %v2397_v5  ;;  %v2390_v13 = vpop.f32.mrb[42].mxu1 }
 0x5cc   : > { %v3606_v14 = vpop.f32.mrb[43].mxu1 }
 0x5cd   : > { %v2407_v15 = vadd.f32 %v3237_v10, %v2399_v12 }
 0x5cf   : > { %v2408_v17 = vadd.f32 %v3803_v16, %v2407_v15 }
 0x5d1   : > { %v2411_v18 = vsel %vm878_vm2, %v2408_v17, 0.0  ;;  %v2414_v20 = vmul.f32 %v2408_v17, %v2408_v17 }
 0x5d2   : > { %2412 = vadd.xlane.f32.xlu0 %v2411_v18 }
 0x5d3   : > { %v2415_v21 = vsel %vm878_vm2, %v2414_v20, 0.0 }
 0x5d4   : > { %2416 = vadd.xlane.f32.xlu1 %v2415_v21 }
 0x65f   : > { %v2413_v31 = vpop.xlane.xlu0 %2412 }
 0x660   : > { %v2418_v32 = vmul.f32 0.015625, %v2413_v31 }
 0x661   : > { %v2417_v33 = vpop.xlane.xlu1 %2416 }
 0x662   : > { %v2420_v34 = vmul.f32 %v2418_v32, %v2418_v32  ;;  %v2419_v35 = vmul.f32 0.015625, %v2417_v33  ;;  %v2422_v38 = vsub.f32 %v2408_v17, %v2418_v32  ;;  %v3249_v32 = vld [vmem:[%s746_s27] ss:$0 sm:$0xff] }
 0x664   : > { %v2421_v36 = vsub.f32 %v2419_v35, %v2420_v34 }
 0x666   : > { %v2423_v37 = vadd.f32 1e-12, %v2421_v36 }
 0x668   : > { %3795 = vrsqrt.f32 %v2423_v37 }
 0x672   : > { %v3796_v39 = vpop.eup %3795 }
 0x673   : > { %v2425_v41 = vmul.f32 %v3796_v39, %v2422_v38 }
 0x675   : > { %v2432_v43 = vmul.f32 %v3238_v40, %v2425_v41 }
 0x677   : > { %v4414_v44 = vadd.f32 %v3239_v42, %v2432_v43 }
 0x679   : > { %v2440_v45 = vpack.c.bf16 %v4414_v44, %v4414_v44 }
 0x67b   : > { %3248 = vmatmul.mubr.msk.bf16.vlgmr.msra.gmra.mrb[52].mxu0 %vm878_vm2, %v2440_v45 }
 0x67c   : > { %3608 = vmatpush3.bf16.msra.mxu0 (!%p3268_p1), %v3804_v56  ;;  %3615 = vmatprep.mubr.msk.bf16.mxu0 (!%p3268_p1), %vm3908_vm6, %v3907_v57 }
 0x67d   : > { %3609 = vmatprep.subr.bf16.mxu0 (!%p3268_p1), %v3907_v57 }
 0x680   : > { %3610 = vmatpush3.bf16.msra.mxu0 (!%p3268_p1), %v3805_v58 }
 0x681   : > { %3611 = vmatprep.subr.bf16.mxu0 (!%p3268_p1), %v3907_v57 }
 0x684   : > { %3612 = vmatpush3.bf16.msra.mxu0 (!%p3268_p1), %v3806_v59 }
 0x685   : > { %3613 = vmatprep.subr.bf16.mxu0 (!%p3268_p1), %v3907_v57 }
 0x688   : > { %3614 = vmatpush3.bf16.msra.mxu0 (!%p3268_p1), %v3807_v19 }
 0x74e   : > { %v2538_v4 = vpop.f32.mrb[52].mxu0 }
 0x74f   : > { %v2539_v5 = vadd.f32 %v2538_v4, %v2454_v2  ;;  %v2540_v6 = vpop.f32.mrb[53].mxu0 }
 0x750   : > { %v2541_v7 = vadd.f32 %v2540_v6, %v2458_v3  ;;  %v2542_v8 = vpop.f32.mrb[54].mxu0 }
 0x751   : > { %v2545_v9 = vmul.f32 %v2539_v5, %v2539_v5  ;;  %v2543_v10 = vpop.f32.mrb[55].mxu0 }
 0x752   : > { %v2546_v11 = vmul.f32 %v2541_v7, %v2541_v7 }
 0x753   : > { %v2547_v12 = vmul.f32 %v2545_v9, %v2539_v5 }
 0x754   : > { %v2548_v13 = vmul.f32 %v2546_v11, %v2541_v7 }
 0x755   : > { %v2549_v14 = vmul.f32 0.044715, %v2547_v12 }
 0x756   : > { %v2550_v15 = vmul.f32 0.044715, %v2548_v13 }
 0x757   : > { %v2551_v16 = vadd.f32 %v2549_v14, %v2539_v5 }
 0x758   : > { %v2552_v17 = vadd.f32 %v2550_v15, %v2541_v7 }
 0x759   : > { %v2553_v18 = vmul.f32 0.7978846, %v2551_v16 }
 0x75a   : > { %v2554_v20 = vmul.f32 0.7978846, %v2552_v17 }
 0x75b   : > { %3797 = vtanh.f32 %v2553_v18 }
 0x75c   : > { %3799 = vtanh.f32 %v2554_v20 }
 0x765   : > { %v3798_v21 = vpop.eup %3797 }
 0x766   : > { %v3800_v22 = vpop.eup %3799  ;;  %v2557_v23 = vadd.f32 1.0, %v3798_v21 }
 0x767   : > { %v2558_v24 = vadd.f32 1.0, %v3800_v22 }
 0x768   : > { %v2559_v25 = vmul.f32 0.5, %v2557_v23 }
 0x769   : > { %v2560_v26 = vmul.f32 0.5, %v2558_v24 }
 0x76a   : > { %v2561_v27 = vmul.f32 %v2559_v25, %v2539_v5 }
 0x76b   : > { %v2562_v28 = vmul.f32 %v2560_v26, %v2541_v7 }
 0x76c   : > { %v2563_v30 = vpack.c.bf16 %v2561_v27, %v2561_v27 }
 0x76d   : > { %v2564_v29 = vpack.c.bf16 %v2562_v28, %v2562_v28 }
 0x76f   : > { %2732 = vmatprep.mubr.bf16.mxu1 %v2564_v29 }
 0x770   : > { %2733 = vmatmul.mubr.bf16.vlgmr.msra.gmra.mrb[44].mxu1 %v2563_v30 }
 0x843   : > { %v3380_v31 = vpop.f32.mrb[44].mxu1 }
 0x844   : > { %v3381_v33 = vpop.f32.mrb[45].mxu1 }
 0x845   : > { %v3382_v34 = vadd.f32 %v3381_v33, %v3380_v31  ;;  %v3383_v35 = vpop.f32.mrb[46].mxu1 }
 0x846   : > { %v3384_v36 = vpop.f32.mrb[47].mxu1 }
 0x847   : > { %v2735_v37 = vadd.f32 %v3382_v34, %v3249_v32 }
 0x849   : > { %v2740_v38 = vadd.f32 %v2735_v37, %v4414_v44  ;;  %v3266_v44 = vld [vmem:[%s749_s5] ss:$0 sm:$0xff] }
 0x84b   : > { %v2743_v39 = vsel %vm878_vm2, %v2740_v38, 0.0  ;;  %v2746_v40 = vmul.f32 %v2740_v38, %v2740_v38 }
 0x84c   : > { %2744 = vadd.xlane.f32.xlu0 %v2743_v39 }
 0x84d   : > { %v2747_v41 = vsel %vm878_vm2, %v2746_v40, 0.0 }
 0x84e   : > { %2748 = vadd.xlane.f32.xlu1 %v2747_v41 }
 0x8d9   : > { %v2745_v42 = vpop.xlane.xlu0 %2744 }
 0x8da   : > { %v2750_v43 = vmul.f32 0.015625, %v2745_v42 }
 0x8db   : > { %v2749_v45 = vpop.xlane.xlu1 %2748 }
 0x8dc   : > { %v2752_v46 = vmul.f32 %v2750_v43, %v2750_v43  ;;  %v2751_v47 = vmul.f32 0.015625, %v2749_v45  ;;  %v2754_v50 = vsub.f32 %v2740_v38, %v2750_v43 }
 0x8de   : > { %v2753_v48 = vsub.f32 %v2751_v47, %v2752_v46 }
 0x8e0   : > { %v2755_v49 = vadd.f32 1e-12, %v2753_v48 }
 0x8e2   : > { %3801 = vrsqrt.f32 %v2755_v49 }
 0x8ec   : > { %v3802_v51 = vpop.eup %3801 }
 0x8ed   : > { %v2757_v52 = vmul.f32 %v3802_v51, %v2754_v50  ;;  %2776 = sbr.rel (%p3268_p1) target bundleno = 2508 (0x9cc), region = 96 }
 0x8ef   : > { %v2764_v54 = vmul.f32 %v3266_v44, %v2757_v52 }
 0x8f1   : > { %v2771_v55 = vadd.f32 %v3267_v53, %v2764_v54 }
 0x8f3   : > { %2772 = vst.msk [vmem:[#allocation2] sm:$0xff] %vm878_vm2, %v2771_v55  ;;  %v2777_v60 = vpack.c.bf16 (!%p3268_p1), %v2771_v55, %v2771_v55 }
 0x8f5   : > { %3616 = vmatmul.mubr.msk.bf16.vlgmr.msra.gmra.mrb[0].mxu0 %vm878_vm2, %v2777_v60 }
 0x9c8   : > { %v2848_v62 = vpop.f32.mrb[0].mxu0 }
 0x9c9   : > { %v2849_v63 = vadd.f32 %v2848_v62, %v2786_v61  ;;  %v3617_v0 = vpop.f32.mrb[1].mxu0 }
 0x9ca   : > { %v2851_v1 = vpop.f32.mrb[2].mxu0 }
 0x9cb   : > { %2854 = vst [vmem:[%s4141_s20] sm:$0x1] %v2849_v63  ;;  %v3618_v2 = vpop.f32.mrb[3].mxu0 }
 0x9cc PF: > { %s4603_s14 = sld [smem:[#allocation9_spill]]  ;;  %s4605_s27 = sld [smem:[#allocation29_spill]] }
 0x9cd   : > { %s2868_s2 = sshll.u32 %s4141_s20, 4  ;;  %s4607_s3 = sand.u32 1, %s3878_s25   ;;  %s2869_s2 = int_to_ptr.vmem [resolvable:$true] %s2868_s2 }
 0x9ce   : > { %s2856_s4 = scalar_lea.sflag [#allocation4], %s4607_s3  ;;  %s3808_s9 = scalar_lea.vmem %s2869_s2, 16 }
 0x9cf   : > { %p3809_p2 = scmp.ne.s32.totalorder %s2869_s2, %s3808_s9  ;;  %s3909_s10 = smov [#allocation3]  }
 0x9d0   : > { %s3812_s5 = sshll.u32 %s3909_s10, 4  ;;  %s3813_s5 = int_to_ptr.vmem [resolvable:$false] %s3812_s5 }
 0x9d1   : > { %p3810_p4 = pnand %p3809_p2, %p4049_p3  ;;  %s3814_s21 = scalar_lea.vmem %s3813_s5, 32 }
 0x9d2   : > { %s3274_s16 = sshll.u32 %s4603_s14, 4  ;;  %s4606_s22 = smov %s4605_s27 }
 0x9d3   : > { %s4477_s28 = scalar_lea.hbm %s4605_s27, %s3274_s16  ;;  %p3811_p5 = pneg %p3810_p4 }
 0x9d4   : > { %p3815_p6 = scmp.lt.s32.totalorder %s2869_s2, %s3813_s5  ;;  %p3816_p7 = scmp.lt.s32.totalorder %s3814_s21, %s3808_s9 }
 0x9d6   : > { %p3817_p8 = por %p3816_p7, %p3815_p6 }
 0x9d8   : > { %p3818_p10 = pnand %p3817_p8, %p3811_p5 }
 0x9da   : > { %3821 = shalt.err (!%p3818_p10)
}
 0x9db   : > { %s3822_s20 = scalar_lea.hbm %s4477_s28, 16  ;;  %s3826_s29 = scalar_lea.hbm %s4606_s22, 32 }
 0x9dc   : > { %p3823_p11 = scmp.ne.s32.totalorder %s4477_s28, %s3822_s20  ;;  %p3827_p0 = scmp.lt.u32.totalorder %s4477_s28, %s4606_s22 }
 0x9dd   : > { %p3828_p1 = scmp.lt.u32.totalorder %s3826_s29, %s3822_s20  ;;  %p3830_p4 = scmp.lt.u32.totalorder %s3822_s20, %s4477_s28 }
 0x9de   : > { %p3824_p12 = pnand %p3823_p11, %p4049_p3 }
 0x9df   : > { %p3829_p2 = por %p3828_p1, %p3827_p0 }
 0x9e0   : > { %p3825_p13 = pneg %p3824_p12 }
 0x9e1   : > { %p3831_p5 = por %p3830_p4, %p3829_p2 }
 0x9e3   : > { %p3832_p6 = pnand %p3831_p5, %p3825_p13 }
 0x9e5   : > { %3835 = shalt.err (!%p3832_p6)
}
 0x9e6   : > { %3621 = dma.vmem_to_hbm [thread:$0]  (%p4049_p3), %s2869_s2, 16, %s4477_s28, %s2856_s4  }
 0x9e7 PF: > { %s4608_s15 = sld [smem:[#allocation12_spill]]  ;;  %s4609_s18 = sld [smem:[#allocation6_spill]] }
 0x9ed   : > { %p3627_p7 = scmp.ge.s32.totalorder %s4608_s15, 2  ;;  %s2880_s16 = sand.u32 1, %s4609_s18  }
 0x9ee   : > { %s2881_s23 = scalar_lea.sflag [#allocation4], %s2880_s16 }
 0x9ef   : > { %p3624_p8 = pnand %p3627_p7, %p4059_p9 }
 0x9f1   : > { %3869 = dma.done.wait (!%p3624_p8), %s2881_s23, 16  }
 0x9f2   : > { %3871 = vsyncadd (!%p3624_p8), %s2881_s23, 4294967280  ;;  %s30_s30 = sadd.s32 1, %s4608_s15   ;;  %s4611_s1 = sld [smem:[#allocation7_spill]] }
 0x9f3   : > { %p27_p10 = scmp.ge.s32.totalorder %s30_s30, 6   ;;  %s4612_s26 = sld [smem:[#allocation17_spill]] }
 0x9f4   : > { %s4613_s27 = sld [smem:[#allocation10_spill]]  ;;  %s4614_s28 = sld [smem:[#allocation11_spill]] }
 0x9f5   : > { %s4615_s29 = sld [smem:[#allocation13_spill]]  ;;  %s4616_s0 = sld [smem:[#allocation15_spill]] }
 0x9f6   : > { %s4617_s24 = smov %s3878_s25  ;;  %29 = sbr.rel (!%p27_p10) target bundleno = 18 (0x12), region = 171 }
 0x9f8   : > { %s4618_s25 = smov %s4611_s1 }
 0x9fd   :  { %2885 = vsyncpa [#allocation4], 1 }
 0x9fe   :  { %2887 = vsyncpa [#allocation4 + $0x1], 1 }

</bundles_post_ra>
